<compile_context>
chip_gen: v6e
topology: v6e:2x2x1
jax: 0.10.0
libtpu: 0.0.40
codegen_flags: <defaults>
</compile_context>

<pallas_src>
import math

import jax
import jax.numpy as jnp
from jax import lax
from jax.experimental import pallas as pl
from jax.experimental.pallas import tpu as pltpu

# Model dimensions (module defaults; vocab chosen small + lane-friendly).
VOCAB = 128          # vocab_size
EMB = 512            # embedding_dim
HID = 256            # self.hidden_dim
FF = 512             # dim_feedforward
NHEAD = 4
HEAD = HID // NHEAD  # 64
MAX_LEN = 32         # self.max_length
LN_EPS = 1e-5        # PyTorch LayerNorm default


def _layernorm(x, g, b):
    mu = jnp.mean(x, axis=-1, keepdims=True)
    var = jnp.mean((x - mu) ** 2, axis=-1, keepdims=True)
    return (x - mu) * lax.rsqrt(var + LN_EPS) * g + b


def make_kernel(batch, seq):
    bs = batch * seq
    scale = 1.0 / math.sqrt(HEAD)

    def kernel(ids_ref, emb_ref,
               w_in_ref, b_in_ref,
               wqkv_ref, bqkv_ref,
               wo_ref, bo_ref,
               ln1g_ref, ln1b_ref, ln2g_ref, ln2b_ref,
               w1_ref, b1_ref, w2_ref, b2_ref,
               wout_ref, bout_ref,
               out_ref):
        f32 = jnp.float32
        bf16 = jnp.bfloat16

        ids = ids_ref[...]                                               # (bs, 1) int32
        lane = lax.broadcasted_iota(jnp.int32, (bs, VOCAB), 1)
        # One-hot reused twice: embedding gather (as matmul) and copy bias.
        oneh = (ids == lane).astype(f32)                                 # (bs, V) f32

        def mm(a_f32, w_ref, b_ref=None):
            # bf16 x bf16 MXU matmul with f32 accumulation; bias add in f32.
            y = jnp.dot(a_f32.astype(bf16), w_ref[...],
                        preferred_element_type=f32)
            if b_ref is not None:
                y = y + b_ref[...]
            return y

        # token_embeddings = self.embeddings(input_ids)
        # (exact: one-hot is 0/1 so bf16 products accumulate the bf16 rows)
        x = mm(oneh, emb_ref)                                            # (bs, EMB)

        # hidden = self.input_projection(token_embeddings)
        h = mm(x, w_in_ref, b_in_ref)                                    # (bs, HID)

        # ---- TransformerEncoderLayer (batch_first, post-LN, ReLU, eval dropout) ----
        # Fused QKV projection: one matmul, 128-lane-aligned slices.
        qkv = mm(h, wqkv_ref, bqkv_ref)                                  # (bs, 3*HID)
        q = qkv[:, :HID]
        k = qkv[:, HID:2 * HID]
        v = qkv[:, 2 * HID:]

        def to_heads(t):
            # (bs, HID) -> (batch*NHEAD, seq, HEAD).
            # Row-dim reshape is a pure major-dim split (layout-free); head
            # split is 4 static lane slices stacked on a new major axis.
            t3 = t.reshape(batch, seq, HID)
            th = jnp.stack(
                [t3[:, :, i * HEAD:(i + 1) * HEAD] for i in range(NHEAD)],
                axis=1)                                                  # (B, H, S, D)
            return th.reshape(batch * NHEAD, seq, HEAD)

        qh = to_heads(q)
        kh = to_heads(k)
        vh = to_heads(v)

        # One batched matmul for all (batch, head) scores + one fused softmax.
        s = jnp.einsum('bqd,bkd->bqk', qh, kh,
                       preferred_element_type=f32) * scale               # (B*H, S, S)
        s = s - jnp.max(s, axis=-1, keepdims=True)
        e = jnp.exp(s)
        p = e / jnp.sum(e, axis=-1, keepdims=True)
        ctxh = jnp.einsum('bqk,bkd->bqd', p, vh,
                          preferred_element_type=f32)                    # (B*H, S, D)

        # Merge heads back: (B*H,S,D) -> (B,H,S,D) -> lane-concat -> (bs, HID)
        ctx4 = ctxh.reshape(batch, NHEAD, seq, HEAD)
        ctx = jnp.concatenate([ctx4[:, i] for i in range(NHEAD)], axis=-1)
        ctx = ctx.reshape(bs, HID)

        attn = mm(ctx, wo_ref, bo_ref)
        y = _layernorm(h + attn, ln1g_ref[...], ln1b_ref[...])           # norm1(x + attn)

        f = jnp.maximum(mm(y, w1_ref, b1_ref), 0.0)                      # ReLU
        f = mm(f, w2_ref, b2_ref)
        z = _layernorm(y + f, ln2g_ref[...], ln2b_ref[...])              # norm2(x + ff)

        # logits = self.output_projection(transformed); final = logits + one_hot*2
        logits = mm(z, wout_ref, bout_ref)                               # (bs, V)
        final = logits + oneh * 2.0

        # argmax over vocab (first-max-index tie-break) via max/where/min.
        m = jnp.max(final, axis=-1, keepdims=True)
        cand = jnp.where(final == m, lane, VOCAB)
        out_ref[...] = jnp.min(cand, axis=-1, keepdims=True)             # (bs, 1) int32

    return kernel


def init_params(key):
    """Deterministic synthetic parameters (shapes from the module __init__)."""
    ks = jax.random.split(key, 16)

    def w(k, shape, s=0.05):
        return jax.random.normal(k, shape, jnp.float32) * s

    zeros = lambda d: jnp.zeros((1, d), jnp.float32)
    ones = lambda d: jnp.ones((1, d), jnp.float32)
    return dict(
        emb=w(ks[0], (VOCAB, EMB)),
        w_in=w(ks[1], (EMB, HID)), b_in=w(ks[2], (1, HID)),
        wq=w(ks[3], (HID, HID)), bq=zeros(HID),
        wk=w(ks[4], (HID, HID)), bk=zeros(HID),
        wv=w(ks[5], (HID, HID)), bv=zeros(HID),
        wo=w(ks[6], (HID, HID)), bo=zeros(HID),
        ln1g=ones(HID), ln1b=zeros(HID),
        ln2g=ones(HID), ln2b=zeros(HID),
        w1=w(ks[7], (HID, FF)), b1=w(ks[8], (1, FF)),
        w2=w(ks[9], (FF, HID)), b2=w(ks[10], (1, HID)),
        wout=w(ks[11], (HID, VOCAB)), bout=w(ks[12], (1, VOCAB)),
    )


def prepare_params(p):
    """Host-side packing per perf review: bf16 weight matrices, fused QKV."""
    bf = lambda a: a.astype(jnp.bfloat16)
    return dict(
        emb=bf(p['emb']),
        w_in=bf(p['w_in']), b_in=p['b_in'],
        wqkv=bf(jnp.concatenate([p['wq'], p['wk'], p['wv']], axis=1)),   # (HID, 3*HID)
        bqkv=jnp.concatenate([p['bq'], p['bk'], p['bv']], axis=1),       # (1, 3*HID) f32
        wo=bf(p['wo']), bo=p['bo'],
        ln1g=p['ln1g'], ln1b=p['ln1b'], ln2g=p['ln2g'], ln2b=p['ln2b'],
        w1=bf(p['w1']), b1=p['b1'],
        w2=bf(p['w2']), b2=p['b2'],
        wout=bf(p['wout']), bout=p['bout'],
    )


def fixed_mobile_gec_forward(input_ids, p):
    # seq_len > max_length truncation (module semantics)
    input_ids = input_ids[:, :MAX_LEN]
    batch, seq = input_ids.shape
    bs = batch * seq
    ids_flat = input_ids.reshape(bs, 1).astype(jnp.int32)

    args = [ids_flat, p['emb'], p['w_in'], p['b_in'],
            p['wqkv'], p['bqkv'], p['wo'], p['bo'],
            p['ln1g'], p['ln1b'], p['ln2g'], p['ln2b'],
            p['w1'], p['b1'], p['w2'], p['b2'],
            p['wout'], p['bout']]

    def full_spec(shape):
        nd = len(shape)
        return pl.BlockSpec(shape, lambda i, _nd=nd: (0,) * _nd)

    out = pl.pallas_call(
        make_kernel(batch, seq),
        out_shape=jax.ShapeDtypeStruct((bs, 1), jnp.int32),
        grid=(1,),
        in_specs=[full_spec(a.shape) for a in args],
        out_specs=full_spec((bs, 1)),
        compiler_params=pltpu.CompilerParams(
            dimension_semantics=("arbitrary",),
            # ~1.5 MiB of bf16 weights (x2 for default double-buffering) +
            # tiny activations: comfortably below every generation's scoped
            # VMEM default, including v7x.
            vmem_limit_bytes=32 * 1024 * 1024,
        ),
    )(*args)
    # TODO(synk): torch.argmax returns int64; we return int32 (same values).
    return out.reshape(batch, seq)


if __name__ == "__main__":
    key = jax.random.PRNGKey(0)
    pkey, ikey = jax.random.split(key)
    params = prepare_params(init_params(pkey))

    B, S = 2, 8   # small shapes; S <= max_length=32
    input_ids = jax.random.randint(ikey, (B, S), 0, VOCAB, dtype=jnp.int32)

    out = fixed_mobile_gec_forward(input_ids, params)
    out = jax.block_until_ready(out)
    assert out.shape == (B, S) and out.dtype == jnp.int32
    assert bool(jnp.all((out >= 0) & (out < VOCAB)))
    print("KERNEL_OK")
</pallas_src>

<mosaic_0001>
module attributes {stable_mosaic.version = 11 : i64} {
  func.func @kernel(%arg0: i32, %arg1: memref<16x1xi32, #tpu.memory_space<vmem>>, %arg2: memref<128x512xbf16, #tpu.memory_space<vmem>>, %arg3: memref<512x256xbf16, #tpu.memory_space<vmem>>, %arg4: memref<1x256xf32, #tpu.memory_space<vmem>>, %arg5: memref<256x768xbf16, #tpu.memory_space<vmem>>, %arg6: memref<1x768xf32, #tpu.memory_space<vmem>>, %arg7: memref<256x256xbf16, #tpu.memory_space<vmem>>, %arg8: memref<1x256xf32, #tpu.memory_space<vmem>>, %arg9: memref<1x256xf32, #tpu.memory_space<vmem>>, %arg10: memref<1x256xf32, #tpu.memory_space<vmem>>, %arg11: memref<1x256xf32, #tpu.memory_space<vmem>>, %arg12: memref<1x256xf32, #tpu.memory_space<vmem>>, %arg13: memref<256x512xbf16, #tpu.memory_space<vmem>>, %arg14: memref<1x512xf32, #tpu.memory_space<vmem>>, %arg15: memref<512x256xbf16, #tpu.memory_space<vmem>>, %arg16: memref<1x256xf32, #tpu.memory_space<vmem>>, %arg17: memref<256x128xbf16, #tpu.memory_space<vmem>>, %arg18: memref<1x128xf32, #tpu.memory_space<vmem>>, %arg19: memref<16x1xi32, #tpu.memory_space<vmem>>) attributes {dimension_semantics = [#tpu.dimension_semantics<arbitrary>], iteration_bounds = array<i64: 1>, scalar_prefetch = 0 : i64, scratch_operands = 0 : i64, tpu.core_type = #tpu.core_type<tc>, window_params = [{pipeline_mode = #tpu.pipeline_mode<synchronous>, transform_indices = @transform_0, window_bounds = array<i64: 16, 1>}, {pipeline_mode = #tpu.pipeline_mode<synchronous>, transform_indices = @transform_1, window_bounds = array<i64: 128, 512>}, {pipeline_mode = #tpu.pipeline_mode<synchronous>, transform_indices = @transform_2, window_bounds = array<i64: 512, 256>}, {pipeline_mode = #tpu.pipeline_mode<synchronous>, transform_indices = @transform_3, window_bounds = array<i64: 1, 256>}, {pipeline_mode = #tpu.pipeline_mode<synchronous>, transform_indices = @transform_4, window_bounds = array<i64: 256, 768>}, {pipeline_mode = #tpu.pipeline_mode<synchronous>, transform_indices = @transform_5, window_bounds = array<i64: 1, 768>}, {pipeline_mode = #tpu.pipeline_mode<synchronous>, transform_indices = @transform_6, window_bounds = array<i64: 256, 256>}, {pipeline_mode = #tpu.pipeline_mode<synchronous>, transform_indices = @transform_7, window_bounds = array<i64: 1, 256>}, {pipeline_mode = #tpu.pipeline_mode<synchronous>, transform_indices = @transform_8, window_bounds = array<i64: 1, 256>}, {pipeline_mode = #tpu.pipeline_mode<synchronous>, transform_indices = @transform_9, window_bounds = array<i64: 1, 256>}, {pipeline_mode = #tpu.pipeline_mode<synchronous>, transform_indices = @transform_10, window_bounds = array<i64: 1, 256>}, {pipeline_mode = #tpu.pipeline_mode<synchronous>, transform_indices = @transform_11, window_bounds = array<i64: 1, 256>}, {pipeline_mode = #tpu.pipeline_mode<synchronous>, transform_indices = @transform_12, window_bounds = array<i64: 256, 512>}, {pipeline_mode = #tpu.pipeline_mode<synchronous>, transform_indices = @transform_13, window_bounds = array<i64: 1, 512>}, {pipeline_mode = #tpu.pipeline_mode<synchronous>, transform_indices = @transform_14, window_bounds = array<i64: 512, 256>}, {pipeline_mode = #tpu.pipeline_mode<synchronous>, transform_indices = @transform_15, window_bounds = array<i64: 1, 256>}, {pipeline_mode = #tpu.pipeline_mode<synchronous>, transform_indices = @transform_16, window_bounds = array<i64: 256, 128>}, {pipeline_mode = #tpu.pipeline_mode<synchronous>, transform_indices = @transform_17, window_bounds = array<i64: 1, 128>}, {pipeline_mode = #tpu.pipeline_mode<synchronous>, transform_indices = @transform_18, window_bounds = array<i64: 16, 1>}]} {
    %c0 = arith.constant 0 : index
    %c0_0 = arith.constant 0 : index
    %0 = vector.load %arg1[%c0, %c0_0] : memref<16x1xi32, #tpu.memory_space<vmem>>, vector<16x1xi32>
    %1 = tpu.iota {dimensions = array<i32: 1>} : vector<16x128xi32>
    %2 = vector.broadcast %0 : vector<16x1xi32> to vector<16x128xi32>
    %3 = arith.cmpi eq, %2, %1 : vector<16x128xi32>
    %4 = arith.extui %3 : vector<16x128xi1> to vector<16x128xi32>
    %5 = arith.sitofp %4 : vector<16x128xi32> to vector<16x128xf32>
    %6 = arith.truncf %5 : vector<16x128xf32> to vector<16x128xbf16>
    %c0_1 = arith.constant 0 : index
    %c0_2 = arith.constant 0 : index
    %7 = vector.load %arg2[%c0_1, %c0_2] : memref<128x512xbf16, #tpu.memory_space<vmem>>, vector<128x512xbf16>
    %cst = arith.constant dense<0.000000e+00> : vector<16x512xf32>
    %8 = tpu.matmul %6, %7, %cst {dimension_numbers = #tpu.dot_dimension_numbers<[1], [0], [0], [1], [0, 0, 1, 1], [], []>} : vector<16x128xbf16>, vector<128x512xbf16>, vector<16x512xf32> -> vector<16x512xf32>
    %9 = arith.truncf %8 : vector<16x512xf32> to vector<16x512xbf16>
    %c0_3 = arith.constant 0 : index
    %c0_4 = arith.constant 0 : index
    %10 = vector.load %arg3[%c0_3, %c0_4] : memref<512x256xbf16, #tpu.memory_space<vmem>>, vector<512x256xbf16>
    %cst_5 = arith.constant dense<0.000000e+00> : vector<16x256xf32>
    %11 = tpu.matmul %9, %10, %cst_5 {dimension_numbers = #tpu.dot_dimension_numbers<[1], [0], [0], [1], [0, 0, 1, 1], [], []>} : vector<16x512xbf16>, vector<512x256xbf16>, vector<16x256xf32> -> vector<16x256xf32>
    %c0_6 = arith.constant 0 : index
    %c0_7 = arith.constant 0 : index
    %12 = vector.load %arg4[%c0_6, %c0_7] : memref<1x256xf32, #tpu.memory_space<vmem>>, vector<1x256xf32>
    %13 = vector.broadcast %12 : vector<1x256xf32> to vector<16x256xf32>
    %14 = arith.addf %11, %13 : vector<16x256xf32>
    %15 = arith.truncf %14 : vector<16x256xf32> to vector<16x256xbf16>
    %c0_8 = arith.constant 0 : index
    %c0_9 = arith.constant 0 : index
    %16 = vector.load %arg5[%c0_8, %c0_9] : memref<256x768xbf16, #tpu.memory_space<vmem>>, vector<256x768xbf16>
    %cst_10 = arith.constant dense<0.000000e+00> : vector<16x768xf32>
    %17 = tpu.matmul %15, %16, %cst_10 {dimension_numbers = #tpu.dot_dimension_numbers<[1], [0], [0], [1], [0, 0, 1, 1], [], []>} : vector<16x256xbf16>, vector<256x768xbf16>, vector<16x768xf32> -> vector<16x768xf32>
    %c0_11 = arith.constant 0 : index
    %c0_12 = arith.constant 0 : index
    %18 = vector.load %arg6[%c0_11, %c0_12] : memref<1x768xf32, #tpu.memory_space<vmem>>, vector<1x768xf32>
    %19 = vector.broadcast %18 : vector<1x768xf32> to vector<16x768xf32>
    %20 = arith.addf %17, %19 : vector<16x768xf32>
    %21 = vector.extract_strided_slice %20 {offsets = [0, 0], sizes = [16, 256], strides = [1, 1]} : vector<16x768xf32> to vector<16x256xf32>
    %22 = vector.extract_strided_slice %20 {offsets = [0, 256], sizes = [16, 256], strides = [1, 1]} : vector<16x768xf32> to vector<16x256xf32>
    %23 = vector.extract_strided_slice %20 {offsets = [0, 512], sizes = [16, 256], strides = [1, 1]} : vector<16x768xf32> to vector<16x256xf32>
    %24 = vector.shape_cast %21 : vector<16x256xf32> to vector<2x8x256xf32>
    %25 = vector.extract_strided_slice %24 {offsets = [0, 0, 0], sizes = [2, 8, 64], strides = [1, 1, 1]} : vector<2x8x256xf32> to vector<2x8x64xf32>
    %26 = vector.extract_strided_slice %24 {offsets = [0, 0, 64], sizes = [2, 8, 64], strides = [1, 1, 1]} : vector<2x8x256xf32> to vector<2x8x64xf32>
    %27 = vector.extract_strided_slice %24 {offsets = [0, 0, 128], sizes = [2, 8, 64], strides = [1, 1, 1]} : vector<2x8x256xf32> to vector<2x8x64xf32>
    %28 = vector.extract_strided_slice %24 {offsets = [0, 0, 192], sizes = [2, 8, 64], strides = [1, 1, 1]} : vector<2x8x256xf32> to vector<2x8x64xf32>
    %29 = vector.shape_cast %25 : vector<2x8x64xf32> to vector<2x1x8x64xf32>
    %30 = vector.shape_cast %26 : vector<2x8x64xf32> to vector<2x1x8x64xf32>
    %31 = vector.shape_cast %27 : vector<2x8x64xf32> to vector<2x1x8x64xf32>
    %32 = vector.shape_cast %28 : vector<2x8x64xf32> to vector<2x1x8x64xf32>
    %33 = tpu.concatenate %29, %30, %31, %32 in 1 : vector<2x1x8x64xf32>, vector<2x1x8x64xf32>, vector<2x1x8x64xf32>, vector<2x1x8x64xf32> -> vector<2x4x8x64xf32>
    %34 = vector.shape_cast %33 : vector<2x4x8x64xf32> to vector<8x8x64xf32>
    %35 = vector.shape_cast %22 : vector<16x256xf32> to vector<2x8x256xf32>
    %36 = vector.extract_strided_slice %35 {offsets = [0, 0, 0], sizes = [2, 8, 64], strides = [1, 1, 1]} : vector<2x8x256xf32> to vector<2x8x64xf32>
    %37 = vector.extract_strided_slice %35 {offsets = [0, 0, 64], sizes = [2, 8, 64], strides = [1, 1, 1]} : vector<2x8x256xf32> to vector<2x8x64xf32>
    %38 = vector.extract_strided_slice %35 {offsets = [0, 0, 128], sizes = [2, 8, 64], strides = [1, 1, 1]} : vector<2x8x256xf32> to vector<2x8x64xf32>
    %39 = vector.extract_strided_slice %35 {offsets = [0, 0, 192], sizes = [2, 8, 64], strides = [1, 1, 1]} : vector<2x8x256xf32> to vector<2x8x64xf32>
    %40 = vector.shape_cast %36 : vector<2x8x64xf32> to vector<2x1x8x64xf32>
    %41 = vector.shape_cast %37 : vector<2x8x64xf32> to vector<2x1x8x64xf32>
    %42 = vector.shape_cast %38 : vector<2x8x64xf32> to vector<2x1x8x64xf32>
    %43 = vector.shape_cast %39 : vector<2x8x64xf32> to vector<2x1x8x64xf32>
    %44 = tpu.concatenate %40, %41, %42, %43 in 1 : vector<2x1x8x64xf32>, vector<2x1x8x64xf32>, vector<2x1x8x64xf32>, vector<2x1x8x64xf32> -> vector<2x4x8x64xf32>
    %45 = vector.shape_cast %44 : vector<2x4x8x64xf32> to vector<8x8x64xf32>
    %46 = vector.shape_cast %23 : vector<16x256xf32> to vector<2x8x256xf32>
    %47 = vector.extract_strided_slice %46 {offsets = [0, 0, 0], sizes = [2, 8, 64], strides = [1, 1, 1]} : vector<2x8x256xf32> to vector<2x8x64xf32>
    %48 = vector.extract_strided_slice %46 {offsets = [0, 0, 64], sizes = [2, 8, 64], strides = [1, 1, 1]} : vector<2x8x256xf32> to vector<2x8x64xf32>
    %49 = vector.extract_strided_slice %46 {offsets = [0, 0, 128], sizes = [2, 8, 64], strides = [1, 1, 1]} : vector<2x8x256xf32> to vector<2x8x64xf32>
    %50 = vector.extract_strided_slice %46 {offsets = [0, 0, 192], sizes = [2, 8, 64], strides = [1, 1, 1]} : vector<2x8x256xf32> to vector<2x8x64xf32>
    %51 = vector.shape_cast %47 : vector<2x8x64xf32> to vector<2x1x8x64xf32>
    %52 = vector.shape_cast %48 : vector<2x8x64xf32> to vector<2x1x8x64xf32>
    %53 = vector.shape_cast %49 : vector<2x8x64xf32> to vector<2x1x8x64xf32>
    %54 = vector.shape_cast %50 : vector<2x8x64xf32> to vector<2x1x8x64xf32>
    %55 = tpu.concatenate %51, %52, %53, %54 in 1 : vector<2x1x8x64xf32>, vector<2x1x8x64xf32>, vector<2x1x8x64xf32>, vector<2x1x8x64xf32> -> vector<2x4x8x64xf32>
    %56 = vector.shape_cast %55 : vector<2x4x8x64xf32> to vector<8x8x64xf32>
    "tpu.trace_start"() <{level = 10 : i32, message = "bqd,bkd->bqk"}> : () -> ()
    %cst_13 = arith.constant dense<0.000000e+00> : vector<8x8x8xf32>
    %57 = tpu.matmul %34, %45, %cst_13 {dimension_numbers = #tpu.dot_dimension_numbers<[2], [2], [1], [1], [0, 0, 0, 1, 1, 1], [0], [0]>} : vector<8x8x64xf32>, vector<8x8x64xf32>, vector<8x8x8xf32> -> vector<8x8x8xf32>
    "tpu.trace_stop"() : () -> ()
    %cst_14 = arith.constant 1.250000e-01 : f32
    %58 = vector.broadcast %cst_14 : f32 to vector<8x8x8xf32>
    %59 = arith.mulf %57, %58 : vector<8x8x8xf32>
    %cst_15 = arith.constant dense<0xFF800000> : vector<8x8xf32>
    %60 = vector.multi_reduction <maximumf>, %59, %cst_15 [2] : vector<8x8x8xf32> to vector<8x8xf32>
    %61 = vector.shape_cast %60 : vector<8x8xf32> to vector<8x8x1xf32>
    %62 = vector.broadcast %61 : vector<8x8x1xf32> to vector<8x8x8xf32>
    %63 = arith.subf %59, %62 : vector<8x8x8xf32>
    %64 = math.exp %63 : vector<8x8x8xf32>
    %cst_16 = arith.constant dense<0.000000e+00> : vector<8x8xf32>
    %65 = vector.multi_reduction <add>, %64, %cst_16 [2] : vector<8x8x8xf32> to vector<8x8xf32>
    %66 = vector.shape_cast %65 : vector<8x8xf32> to vector<8x8x1xf32>
    %67 = vector.broadcast %66 : vector<8x8x1xf32> to vector<8x8x8xf32>
    %68 = arith.divf %64, %67 : vector<8x8x8xf32>
    "tpu.trace_start"() <{level = 10 : i32, message = "bqk,bkd->bqd"}> : () -> ()
    %cst_17 = arith.constant dense<0.000000e+00> : vector<8x8x64xf32>
    %69 = tpu.matmul %68, %56, %cst_17 {dimension_numbers = #tpu.dot_dimension_numbers<[2], [1], [1], [2], [0, 0, 0, 1, 1, 2], [0], [0]>} : vector<8x8x8xf32>, vector<8x8x64xf32>, vector<8x8x64xf32> -> vector<8x8x64xf32>
    "tpu.trace_stop"() : () -> ()
    %70 = vector.shape_cast %69 : vector<8x8x64xf32> to vector<2x4x8x64xf32>
    %71 = vector.extract_strided_slice %70 {offsets = [0, 0, 0, 0], sizes = [2, 1, 8, 64], strides = [1, 1, 1, 1]} : vector<2x4x8x64xf32> to vector<2x1x8x64xf32>
    %72 = vector.shape_cast %71 : vector<2x1x8x64xf32> to vector<2x8x64xf32>
    %73 = vector.extract_strided_slice %70 {offsets = [0, 1, 0, 0], sizes = [2, 1, 8, 64], strides = [1, 1, 1, 1]} : vector<2x4x8x64xf32> to vector<2x1x8x64xf32>
    %74 = vector.shape_cast %73 : vector<2x1x8x64xf32> to vector<2x8x64xf32>
    %75 = vector.extract_strided_slice %70 {offsets = [0, 2, 0, 0], sizes = [2, 1, 8, 64], strides = [1, 1, 1, 1]} : vector<2x4x8x64xf32> to vector<2x1x8x64xf32>
    %76 = vector.shape_cast %75 : vector<2x1x8x64xf32> to vector<2x8x64xf32>
    %77 = vector.extract_strided_slice %70 {offsets = [0, 3, 0, 0], sizes = [2, 1, 8, 64], strides = [1, 1, 1, 1]} : vector<2x4x8x64xf32> to vector<2x1x8x64xf32>
    %78 = vector.shape_cast %77 : vector<2x1x8x64xf32> to vector<2x8x64xf32>
    %79 = tpu.concatenate %72, %74, %76, %78 in 2 : vector<2x8x64xf32>, vector<2x8x64xf32>, vector<2x8x64xf32>, vector<2x8x64xf32> -> vector<2x8x256xf32>
    %80 = vector.shape_cast %79 : vector<2x8x256xf32> to vector<16x256xf32>
    %81 = arith.truncf %80 : vector<16x256xf32> to vector<16x256xbf16>
    %c0_18 = arith.constant 0 : index
    %c0_19 = arith.constant 0 : index
    %82 = vector.load %arg7[%c0_18, %c0_19] : memref<256x256xbf16, #tpu.memory_space<vmem>>, vector<256x256xbf16>
    %cst_20 = arith.constant dense<0.000000e+00> : vector<16x256xf32>
    %83 = tpu.matmul %81, %82, %cst_20 {dimension_numbers = #tpu.dot_dimension_numbers<[1], [0], [0], [1], [0, 0, 1, 1], [], []>} : vector<16x256xbf16>, vector<256x256xbf16>, vector<16x256xf32> -> vector<16x256xf32>
    %c0_21 = arith.constant 0 : index
    %c0_22 = arith.constant 0 : index
    %84 = vector.load %arg8[%c0_21, %c0_22] : memref<1x256xf32, #tpu.memory_space<vmem>>, vector<1x256xf32>
    %85 = vector.broadcast %84 : vector<1x256xf32> to vector<16x256xf32>
    %86 = arith.addf %83, %85 : vector<16x256xf32>
    %87 = arith.addf %14, %86 : vector<16x256xf32>
    %c0_23 = arith.constant 0 : index
    %c0_24 = arith.constant 0 : index
    %88 = vector.load %arg9[%c0_23, %c0_24] : memref<1x256xf32, #tpu.memory_space<vmem>>, vector<1x256xf32>
    %c0_25 = arith.constant 0 : index
    %c0_26 = arith.constant 0 : index
    %89 = vector.load %arg10[%c0_25, %c0_26] : memref<1x256xf32, #tpu.memory_space<vmem>>, vector<1x256xf32>
    %cst_27 = arith.constant dense<0.000000e+00> : vector<16xf32>
    %90 = vector.multi_reduction <add>, %87, %cst_27 [1] : vector<16x256xf32> to vector<16xf32>
    %91 = vector.shape_cast %90 : vector<16xf32> to vector<16x1xf32>
    %cst_28 = arith.constant 2.560000e+02 : f32
    %92 = vector.broadcast %cst_28 : f32 to vector<16x1xf32>
    %93 = arith.divf %91, %92 : vector<16x1xf32>
    %94 = vector.broadcast %93 : vector<16x1xf32> to vector<16x256xf32>
    %95 = arith.subf %87, %94 : vector<16x256xf32>
    %96 = arith.mulf %95, %95 : vector<16x256xf32>
    %cst_29 = arith.constant dense<0.000000e+00> : vector<16xf32>
    %97 = vector.multi_reduction <add>, %96, %cst_29 [1] : vector<16x256xf32> to vector<16xf32>
    %98 = vector.shape_cast %97 : vector<16xf32> to vector<16x1xf32>
    %cst_30 = arith.constant 2.560000e+02 : f32
    %99 = vector.broadcast %cst_30 : f32 to vector<16x1xf32>
    %100 = arith.divf %98, %99 : vector<16x1xf32>
    %101 = vector.broadcast %93 : vector<16x1xf32> to vector<16x256xf32>
    %102 = arith.subf %87, %101 : vector<16x256xf32>
    %cst_31 = arith.constant 9.99999974E-6 : f32
    %103 = vector.broadcast %cst_31 : f32 to vector<16x1xf32>
    %104 = arith.addf %100, %103 : vector<16x1xf32>
    %105 = math.rsqrt %104 : vector<16x1xf32>
    %106 = vector.broadcast %105 : vector<16x1xf32> to vector<16x256xf32>
    %107 = arith.mulf %102, %106 : vector<16x256xf32>
    %108 = vector.broadcast %88 : vector<1x256xf32> to vector<16x256xf32>
    %109 = arith.mulf %107, %108 : vector<16x256xf32>
    %110 = vector.broadcast %89 : vector<1x256xf32> to vector<16x256xf32>
    %111 = arith.addf %109, %110 : vector<16x256xf32>
    %112 = arith.truncf %111 : vector<16x256xf32> to vector<16x256xbf16>
    %c0_32 = arith.constant 0 : index
    %c0_33 = arith.constant 0 : index
    %113 = vector.load %arg13[%c0_32, %c0_33] : memref<256x512xbf16, #tpu.memory_space<vmem>>, vector<256x512xbf16>
    %cst_34 = arith.constant dense<0.000000e+00> : vector<16x512xf32>
    %114 = tpu.matmul %112, %113, %cst_34 {dimension_numbers = #tpu.dot_dimension_numbers<[1], [0], [0], [1], [0, 0, 1, 1], [], []>} : vector<16x256xbf16>, vector<256x512xbf16>, vector<16x512xf32> -> vector<16x512xf32>
    %c0_35 = arith.constant 0 : index
    %c0_36 = arith.constant 0 : index
    %115 = vector.load %arg14[%c0_35, %c0_36] : memref<1x512xf32, #tpu.memory_space<vmem>>, vector<1x512xf32>
    %116 = vector.broadcast %115 : vector<1x512xf32> to vector<16x512xf32>
    %117 = arith.addf %114, %116 : vector<16x512xf32>
    %cst_37 = arith.constant 0.000000e+00 : f32
    %118 = vector.broadcast %cst_37 : f32 to vector<16x512xf32>
    %119 = arith.maximumf %117, %118 : vector<16x512xf32>
    %120 = arith.truncf %119 : vector<16x512xf32> to vector<16x512xbf16>
    %c0_38 = arith.constant 0 : index
    %c0_39 = arith.constant 0 : index
    %121 = vector.load %arg15[%c0_38, %c0_39] : memref<512x256xbf16, #tpu.memory_space<vmem>>, vector<512x256xbf16>
    %cst_40 = arith.constant dense<0.000000e+00> : vector<16x256xf32>
    %122 = tpu.matmul %120, %121, %cst_40 {dimension_numbers = #tpu.dot_dimension_numbers<[1], [0], [0], [1], [0, 0, 1, 1], [], []>} : vector<16x512xbf16>, vector<512x256xbf16>, vector<16x256xf32> -> vector<16x256xf32>
    %c0_41 = arith.constant 0 : index
    %c0_42 = arith.constant 0 : index
    %123 = vector.load %arg16[%c0_41, %c0_42] : memref<1x256xf32, #tpu.memory_space<vmem>>, vector<1x256xf32>
    %124 = vector.broadcast %123 : vector<1x256xf32> to vector<16x256xf32>
    %125 = arith.addf %122, %124 : vector<16x256xf32>
    %126 = arith.addf %111, %125 : vector<16x256xf32>
    %c0_43 = arith.constant 0 : index
    %c0_44 = arith.constant 0 : index
    %127 = vector.load %arg11[%c0_43, %c0_44] : memref<1x256xf32, #tpu.memory_space<vmem>>, vector<1x256xf32>
    %c0_45 = arith.constant 0 : index
    %c0_46 = arith.constant 0 : index
    %128 = vector.load %arg12[%c0_45, %c0_46] : memref<1x256xf32, #tpu.memory_space<vmem>>, vector<1x256xf32>
    %cst_47 = arith.constant dense<0.000000e+00> : vector<16xf32>
    %129 = vector.multi_reduction <add>, %126, %cst_47 [1] : vector<16x256xf32> to vector<16xf32>
    %130 = vector.shape_cast %129 : vector<16xf32> to vector<16x1xf32>
    %cst_48 = arith.constant 2.560000e+02 : f32
    %131 = vector.broadcast %cst_48 : f32 to vector<16x1xf32>
    %132 = arith.divf %130, %131 : vector<16x1xf32>
    %133 = vector.broadcast %132 : vector<16x1xf32> to vector<16x256xf32>
    %134 = arith.subf %126, %133 : vector<16x256xf32>
    %135 = arith.mulf %134, %134 : vector<16x256xf32>
    %cst_49 = arith.constant dense<0.000000e+00> : vector<16xf32>
    %136 = vector.multi_reduction <add>, %135, %cst_49 [1] : vector<16x256xf32> to vector<16xf32>
    %137 = vector.shape_cast %136 : vector<16xf32> to vector<16x1xf32>
    %cst_50 = arith.constant 2.560000e+02 : f32
    %138 = vector.broadcast %cst_50 : f32 to vector<16x1xf32>
    %139 = arith.divf %137, %138 : vector<16x1xf32>
    %140 = vector.broadcast %132 : vector<16x1xf32> to vector<16x256xf32>
    %141 = arith.subf %126, %140 : vector<16x256xf32>
    %cst_51 = arith.constant 9.99999974E-6 : f32
    %142 = vector.broadcast %cst_51 : f32 to vector<16x1xf32>
    %143 = arith.addf %139, %142 : vector<16x1xf32>
    %144 = math.rsqrt %143 : vector<16x1xf32>
    %145 = vector.broadcast %144 : vector<16x1xf32> to vector<16x256xf32>
    %146 = arith.mulf %141, %145 : vector<16x256xf32>
    %147 = vector.broadcast %127 : vector<1x256xf32> to vector<16x256xf32>
    %148 = arith.mulf %146, %147 : vector<16x256xf32>
    %149 = vector.broadcast %128 : vector<1x256xf32> to vector<16x256xf32>
    %150 = arith.addf %148, %149 : vector<16x256xf32>
    %151 = arith.truncf %150 : vector<16x256xf32> to vector<16x256xbf16>
    %c0_52 = arith.constant 0 : index
    %c0_53 = arith.constant 0 : index
    %152 = vector.load %arg17[%c0_52, %c0_53] : memref<256x128xbf16, #tpu.memory_space<vmem>>, vector<256x128xbf16>
    %cst_54 = arith.constant dense<0.000000e+00> : vector<16x128xf32>
    %153 = tpu.matmul %151, %152, %cst_54 {dimension_numbers = #tpu.dot_dimension_numbers<[1], [0], [0], [1], [0, 0, 1, 1], [], []>} : vector<16x256xbf16>, vector<256x128xbf16>, vector<16x128xf32> -> vector<16x128xf32>
    %c0_55 = arith.constant 0 : index
    %c0_56 = arith.constant 0 : index
    %154 = vector.load %arg18[%c0_55, %c0_56] : memref<1x128xf32, #tpu.memory_space<vmem>>, vector<1x128xf32>
    %155 = vector.broadcast %154 : vector<1x128xf32> to vector<16x128xf32>
    %156 = arith.addf %153, %155 : vector<16x128xf32>
    %cst_57 = arith.constant 2.000000e+00 : f32
    %157 = vector.broadcast %cst_57 : f32 to vector<16x128xf32>
    %158 = arith.mulf %5, %157 : vector<16x128xf32>
    %159 = arith.addf %156, %158 : vector<16x128xf32>
    %cst_58 = arith.constant dense<0xFF800000> : vector<16xf32>
    %160 = vector.multi_reduction <maximumf>, %159, %cst_58 [1] : vector<16x128xf32> to vector<16xf32>
    %161 = vector.shape_cast %160 : vector<16xf32> to vector<16x1xf32>
    %162 = vector.broadcast %161 : vector<16x1xf32> to vector<16x128xf32>
    %163 = arith.cmpf oeq, %159, %162 : vector<16x128xf32>
    %c128_i32 = arith.constant 128 : i32
    %164 = vector.broadcast %c128_i32 : i32 to vector<16x128xi32>
    %165 = arith.select %163, %1, %164 : vector<16x128xi1>, vector<16x128xi32>
    %cst_59 = arith.constant dense<2147483647> : vector<16xi32>
    %166 = vector.multi_reduction <minsi>, %165, %cst_59 [1] : vector<16x128xi32> to vector<16xi32>
    %167 = vector.shape_cast %166 : vector<16xi32> to vector<16x1xi32>
    %c0_60 = arith.constant 0 : index
    %c0_61 = arith.constant 0 : index
    %168 = vector.load %arg19[%c0_60, %c0_61] : memref<16x1xi32, #tpu.memory_space<vmem>>, vector<16x1xi32>
    tpu.vector_store %arg19[%c0_60, %c0_61], %167 {strides = array<i32>} : memref<16x1xi32, #tpu.memory_space<vmem>>, vector<16x1xi32>,
    return
  }
  func.func @transform_0(%arg0: i32) -> (i32, i32) {
    %c0_i32 = arith.constant 0 : i32
    %c0_i32_0 = arith.constant 0 : i32
    %c0_i32_1 = arith.constant 0 : i32
    return %c0_i32, %c0_i32_0 : i32, i32
  }
  func.func @transform_1(%arg0: i32) -> (i32, i32) {
    %c0_i32 = arith.constant 0 : i32
    %c0_i32_0 = arith.constant 0 : i32
    %c0_i32_1 = arith.constant 0 : i32
    return %c0_i32, %c0_i32_0 : i32, i32
  }
  func.func @transform_2(%arg0: i32) -> (i32, i32) {
    %c0_i32 = arith.constant 0 : i32
    %c0_i32_0 = arith.constant 0 : i32
    %c0_i32_1 = arith.constant 0 : i32
    return %c0_i32, %c0_i32_0 : i32, i32
  }
  func.func @transform_3(%arg0: i32) -> (i32, i32) {
    %c0_i32 = arith.constant 0 : i32
    %c0_i32_0 = arith.constant 0 : i32
    %c0_i32_1 = arith.constant 0 : i32
    return %c0_i32, %c0_i32_0 : i32, i32
  }
  func.func @transform_4(%arg0: i32) -> (i32, i32) {
    %c0_i32 = arith.constant 0 : i32
    %c0_i32_0 = arith.constant 0 : i32
    %c0_i32_1 = arith.constant 0 : i32
    return %c0_i32, %c0_i32_0 : i32, i32
  }
  func.func @transform_5(%arg0: i32) -> (i32, i32) {
    %c0_i32 = arith.constant 0 : i32
    %c0_i32_0 = arith.constant 0 : i32
    %c0_i32_1 = arith.constant 0 : i32
    return %c0_i32, %c0_i32_0 : i32, i32
  }
  func.func @transform_6(%arg0: i32) -> (i32, i32) {
    %c0_i32 = arith.constant 0 : i32
    %c0_i32_0 = arith.constant 0 : i32
    %c0_i32_1 = arith.constant 0 : i32
    return %c0_i32, %c0_i32_0 : i32, i32
  }
  func.func @transform_7(%arg0: i32) -> (i32, i32) {
    %c0_i32 = arith.constant 0 : i32
    %c0_i32_0 = arith.constant 0 : i32
    %c0_i32_1 = arith.constant 0 : i32
    return %c0_i32, %c0_i32_0 : i32, i32
  }
  func.func @transform_8(%arg0: i32) -> (i32, i32) {
    %c0_i32 = arith.constant 0 : i32
    %c0_i32_0 = arith.constant 0 : i32
    %c0_i32_1 = arith.constant 0 : i32
    return %c0_i32, %c0_i32_0 : i32, i32
  }
  func.func @transform_9(%arg0: i32) -> (i32, i32) {
    %c0_i32 = arith.constant 0 : i32
    %c0_i32_0 = arith.constant 0 : i32
    %c0_i32_1 = arith.constant 0 : i32
    return %c0_i32, %c0_i32_0 : i32, i32
  }
  func.func @transform_10(%arg0: i32) -> (i32, i32) {
    %c0_i32 = arith.constant 0 : i32
    %c0_i32_0 = arith.constant 0 : i32
    %c0_i32_1 = arith.constant 0 : i32
    return %c0_i32, %c0_i32_0 : i32, i32
  }
  func.func @transform_11(%arg0: i32) -> (i32, i32) {
    %c0_i32 = arith.constant 0 : i32
    %c0_i32_0 = arith.constant 0 : i32
    %c0_i32_1 = arith.constant 0 : i32
    return %c0_i32, %c0_i32_0 : i32, i32
  }
  func.func @transform_12(%arg0: i32) -> (i32, i32) {
    %c0_i32 = arith.constant 0 : i32
    %c0_i32_0 = arith.constant 0 : i32
    %c0_i32_1 = arith.constant 0 : i32
    return %c0_i32, %c0_i32_0 : i32, i32
  }
  func.func @transform_13(%arg0: i32) -> (i32, i32) {
    %c0_i32 = arith.constant 0 : i32
    %c0_i32_0 = arith.constant 0 : i32
    %c0_i32_1 = arith.constant 0 : i32
    return %c0_i32, %c0_i32_0 : i32, i32
  }
  func.func @transform_14(%arg0: i32) -> (i32, i32) {
    %c0_i32 = arith.constant 0 : i32
    %c0_i32_0 = arith.constant 0 : i32
    %c0_i32_1 = arith.constant 0 : i32
    return %c0_i32, %c0_i32_0 : i32, i32
  }
  func.func @transform_15(%arg0: i32) -> (i32, i32) {
    %c0_i32 = arith.constant 0 : i32
    %c0_i32_0 = arith.constant 0 : i32
    %c0_i32_1 = arith.constant 0 : i32
    return %c0_i32, %c0_i32_0 : i32, i32
  }
  func.func @transform_16(%arg0: i32) -> (i32, i32) {
    %c0_i32 = arith.constant 0 : i32
    %c0_i32_0 = arith.constant 0 : i32
    %c0_i32_1 = arith.constant 0 : i32
    return %c0_i32, %c0_i32_0 : i32, i32
  }
  func.func @transform_17(%arg0: i32) -> (i32, i32) {
    %c0_i32 = arith.constant 0 : i32
    %c0_i32_0 = arith.constant 0 : i32
    %c0_i32_1 = arith.constant 0 : i32
    return %c0_i32, %c0_i32_0 : i32, i32
  }
  func.func @transform_18(%arg0: i32) -> (i32, i32) {
    %c0_i32 = arith.constant 0 : i32
    %c0_i32_0 = arith.constant 0 : i32
    %c0_i32_1 = arith.constant 0 : i32
    return %c0_i32, %c0_i32_0 : i32, i32
  }
}

</mosaic_0001>

<bundles_post_ra>
// kernel: tpu_custom_call.1
= control target key start
LH: loop header
LB: loop body
LE: loop exit
PB: predicated region body
PF: predicated region fallthrough
CT: control target
= control target key end

     0   :  { %s6376_s0 = inlined_call_operand.vmem [shape: s32[16,1], index: 0, kind: input, shape index: {}]   ;;  %s6377_s1 = inlined_call_operand.hbm [shape: bf16[128,512], index: 1, kind: input, shape index: {}]   ;;  %s6378_s2 = inlined_call_operand.hbm [shape: bf16[512,256], index: 2, kind: input, shape index: {}]   ;;  %s6379_s3 = inlined_call_operand.vmem [shape: f32[1,256], index: 3, kind: input, shape index: {}]   ;;  %s6380_s4 = inlined_call_operand.hbm [shape: bf16[256,768], index: 4, kind: input, shape index: {}]   ;;  %s6381_s5 = inlined_call_operand.vmem [shape: f32[1,768], index: 5, kind: input, shape index: {}]   ;;  %s6382_s6 = inlined_call_operand.hbm [shape: bf16[256,256], index: 6, kind: input, shape index: {}]   ;;  %s6383_s7 = inlined_call_operand.vmem [shape: f32[1,256], index: 7, kind: input, shape index: {}]   ;;  %s6384_s8 = inlined_call_operand.vmem [shape: f32[1,256], index: 8, kind: input, shape index: {}]   ;;  %s6385_s9 = inlined_call_operand.vmem [shape: f32[1,256], index: 9, kind: input, shape index: {}]   ;;  %s6386_s10 = inlined_call_operand.vmem [shape: f32[1,256], index: 10, kind: input, shape index: {}]   ;;  %s6387_s11 = inlined_call_operand.vmem [shape: f32[1,256], index: 11, kind: input, shape index: {}]   ;;  %s6388_s12 = inlined_call_operand.hbm [shape: bf16[256,512], index: 12, kind: input, shape index: {}]   ;;  %s6389_s13 = inlined_call_operand.vmem [shape: f32[1,512], index: 13, kind: input, shape index: {}]   ;;  %s6390_s14 = inlined_call_operand.hbm [shape: bf16[512,256], index: 14, kind: input, shape index: {}]   ;;  %s6391_s15 = inlined_call_operand.vmem [shape: f32[1,256], index: 15, kind: input, shape index: {}]   ;;  %s6392_s16 = inlined_call_operand.hbm [shape: bf16[256,128], index: 16, kind: input, shape index: {}]   ;;  %s6393_s17 = inlined_call_operand.vmem [shape: f32[1,128], index: 17, kind: input, shape index: {}]   ;;  %s6394_s18 = inlined_call_operand.vmem [shape: s32[16,1], index: 18, kind: output, shape index: {}]  }
   0x1   :  { %6396 = sst [smem:[#allocation17_spill]] %s6376_s0 }
   0x2   :  { %6397 = sst [smem:[#allocation18_spill]] %s6377_s1 }
   0x3   :  { %6398 = sst [smem:[#allocation19_spill]] %s6378_s2 }
   0x4   :  { %23 = vsyncpa [#allocation3], 0 }
   0x5   :  { %24 = vsyncpa [#allocation5], 0 }
   0x6   :  { %25 = vsyncpa [#allocation8], 0 }
   0x7   :  { %26 = vsyncpa [#allocation11], 0  ;;  %s5907_s27 = smov [#allocation4]  }
   0x8   :  { %s46_s28 = sshll.u32 %s5907_s27, 4  ;;  %s47_s28 = int_to_ptr.vmem [resolvable:$true] %s46_s28 }
   0x9   :  { %s5767_s29 = scalar_lea.vmem %s47_s28, 8192  ;;  %p5772_p1 = scmp.lt.s32.totalorder %s47_s28, %s47_s28 }
   0xa   :  { %p5768_p0 = scmp.ne.s32.totalorder %s47_s28, %s5767_s29  ;;  %p5773_p2 = scmp.lt.s32.totalorder %s5767_s29, %s5767_s29 }
   0xc   :  { %p5774_p3 = por %p5773_p2, %p5772_p1 }
   0xe   :  { %p5775_p4 = pnand %p5774_p3, %p5768_p0 }
  0x10   :  { %5778 = shalt.err (!%p5775_p4)
}
  0x11   :  { %s5908_s30 = smov 128   ;;  %s5909_s0 = smov 8  }
  0x12   :  { %s6399_s20 = sld [smem:[#allocation19_spill]]  ;;  %s5910_s21 = smov [#allocation7]  }
  0x13   :  { %s74_s22 = sshll.u32 %s5910_s21, 4  ;;  %s5911_s2 = smov [#allocation10]   ;;  %s75_s22 = int_to_ptr.vmem [resolvable:$true] %s74_s22 }
  0x14   :  { %s110_s23 = sshll.u32 %s5911_s2, 4  ;;  %s5787_s24 = scalar_lea.vmem %s75_s22, 4096  ;;  %s111_s23 = int_to_ptr.vmem [resolvable:$true] %s110_s23 }
  0x15   :  { %p5788_p5 = scmp.ne.s32.totalorder %s75_s22, %s5787_s24  ;;  %p5792_p6 = scmp.lt.s32.totalorder %s75_s22, %s75_s22 }
  0x16   :  { %p5793_p7 = scmp.lt.s32.totalorder %s5787_s24, %s5787_s24 }
  0x18   :  { %52 = dma.hbm_to_vmem [thread:$0]  %s6399_s20, 8192, %s47_s28, [#allocation5], %s5908_s30, %s5908_s30, %s5909_s0  }
  0x19   :  { %p5794_p8 = por %p5793_p7, %p5792_p6 }
  0x1b   :  { %p5795_p9 = pnand %p5794_p8, %p5788_p5 }
  0x1d   :  { %5798 = shalt.err (!%p5795_p9)
}
  0x1e   :  { %80 = dma.hbm_to_vmem [thread:$0]  %s6382_s6, 4096, %s75_s22, [#allocation8], %s5908_s30, %s5908_s30, %s5909_s0  }
  0x1f   :  { %s5807_s27 = scalar_lea.vmem %s111_s23, 8192  ;;  %p5812_p11 = scmp.lt.s32.totalorder %s111_s23, %s111_s23 }
  0x20   :  { %p5808_p10 = scmp.ne.s32.totalorder %s111_s23, %s5807_s27  ;;  %p5813_p12 = scmp.lt.s32.totalorder %s5807_s27, %s5807_s27 }
  0x22   :  { %p5814_p13 = por %p5813_p12, %p5812_p11 }
  0x24   :  { %p5815_p0 = pnand %p5814_p13, %p5808_p10 }
  0x26   :  { %5818 = shalt.err (!%p5815_p0)
}
  0x27   :  { %116 = dma.hbm_to_vmem [thread:$0]  %s6390_s14, 8192, %s111_s23, [#allocation11], %s5908_s30, %s5908_s30, %s5909_s0  }
  0x28   :  { %s5912_s19 = smov [#allocation2]  }
  0x29   :  { %s34_s1 = sshll.u32 %s5912_s19, 4  ;;  %s35_s1 = int_to_ptr.vmem [resolvable:$true] %s34_s1 }
  0x2a   :  { %s5827_s20 = scalar_lea.vmem %s35_s1, 4096  ;;  %p5832_p2 = scmp.lt.s32.totalorder %s35_s1, %s35_s1 }
  0x2b   :  { %p5828_p1 = scmp.ne.s32.totalorder %s35_s1, %s5827_s20  ;;  %p5833_p3 = scmp.lt.s32.totalorder %s5827_s20, %s5827_s20 }
  0x2d   :  { %p5834_p4 = por %p5833_p3, %p5832_p2 }
  0x2f   :  { %p5835_p5 = pnand %p5834_p4, %p5828_p1 }
  0x31   :  { %5838 = shalt.err (!%p5835_p5)
}
  0x32   :  { %s5913_s6 = smov 256   ;;  %s5914_s21 = smov 16  }
  0x33   :  { %s6400_s24 = sld [smem:[#allocation18_spill]]  ;;  %s5915_s14 = smov [#allocation6]  }
  0x34   :  { %s60_s30 = sshll.u32 %s5915_s14, 4  ;;  %s61_s30 = int_to_ptr.vmem [resolvable:$true] %s60_s30 }
  0x35   :  { %s5847_s0 = scalar_lea.vmem %s61_s30, 12288  ;;  %p5852_p7 = scmp.lt.s32.totalorder %s61_s30, %s61_s30 }
  0x36   :  { %p5848_p6 = scmp.ne.s32.totalorder %s61_s30, %s5847_s0  ;;  %p5853_p8 = scmp.lt.s32.totalorder %s5847_s0, %s5847_s0 }
  0x38   :  { %p5854_p9 = por %p5853_p8, %p5852_p7 }
  0x39   :  { %40 = dma.hbm_to_vmem [thread:$0]  %s6400_s24, 4096, %s35_s1, [#allocation3], %s5913_s6, %s5913_s6, %s5914_s21  }
  0x3a   :  { %p5855_p10 = pnand %p5854_p9, %p5848_p6 }
  0x3c   :  { %5858 = shalt.err (!%p5855_p10)
}
  0x3d   :  { %s5916_s23 = smov 384   ;;  %s5917_s25 = smov 24  }
  0x3e   :  { %66 = dma.hbm_to_vmem [thread:$0]  %s6380_s4, 12288, %s61_s30, [#allocation5], %s5916_s23, %s5916_s23, %s5917_s25  }
  0x3f   :  { %s5918_s28 = smov [#allocation9]   ;;  %s5919_s19 = smov [#allocation12]  }
  0x40   :  { %s96_s29 = sshll.u32 %s5918_s28, 4  ;;  %s124_s1 = sshll.u32 %s5919_s19, 4  ;;  %s97_s29 = int_to_ptr.vmem [resolvable:$true] %s96_s29  ;;  %s125_s1 = int_to_ptr.vmem [resolvable:$true] %s124_s1 }
  0x41   :  { %s5867_s20 = scalar_lea.vmem %s97_s29, 8192  ;;  %p5872_p12 = scmp.lt.s32.totalorder %s97_s29, %s97_s29 }
  0x42   :  { %p5868_p11 = scmp.ne.s32.totalorder %s97_s29, %s5867_s20  ;;  %p5873_p13 = scmp.lt.s32.totalorder %s5867_s20, %s5867_s20 }
  0x44   :  { %p5874_p0 = por %p5873_p13, %p5872_p12 }
  0x46   :  { %p5875_p1 = pnand %p5874_p0, %p5868_p11 }
  0x48   :  { %5878 = shalt.err (!%p5875_p1)
}
  0x49   :  { %102 = dma.hbm_to_vmem [thread:$0]  %s6388_s12, 8192, %s97_s29, [#allocation8], %s5913_s6, %s5913_s6, %s5914_s21  }
  0x4a   :  { %s5887_s4 = scalar_lea.vmem %s125_s1, 2048  ;;  %p5892_p3 = scmp.lt.s32.totalorder %s125_s1, %s125_s1 }
  0x4b   :  { %p5888_p2 = scmp.ne.s32.totalorder %s125_s1, %s5887_s4  ;;  %p5893_p4 = scmp.lt.s32.totalorder %s5887_s4, %s5887_s4 }
  0x4d   :  { %p5894_p5 = por %p5893_p4, %p5892_p3 }
  0x4f   :  { %p5895_p6 = pnand %p5894_p5, %p5888_p2 }
  0x51   :  { %5898 = shalt.err (!%p5895_p6)
}
  0x52   :  { %s5920_s24 = smov 64   ;;  %s5921_s14 = smov 4  }
  0x53   :  { %130 = dma.hbm_to_vmem [thread:$0]  %s6392_s16, 2048, %s125_s1, [#allocation11], %s5920_s24, %s5920_s24, %s5921_s14  }
  0x54   :  { %5899 = dma.done.wait [#allocation3], 4096  }
  0x55   :  { %5900 = vsyncadd [#allocation3], 4294963200 }
  0x56   :  { %5901 = dma.done.wait [#allocation5], 20480  }
  0x57   :  { %5902 = vsyncadd [#allocation5], 4294946816 }
  0x58   :  { %5903 = dma.done.wait [#allocation8], 12288  }
  0x59   :  { %5904 = vsyncadd [#allocation8], 4294955008 }
  0x5a   :  { %5905 = dma.done.wait [#allocation11], 10240  }
  0x5b   :  { %5906 = vsyncadd [#allocation11], 4294957056  ;;  %v5922_v0 = vmov 0   ;;  %s6401_s21 = sld [smem:[#allocation17_spill]]  ;;  %v5175_v3 = vld [vmem:[#allocation2 + $0xe4] ss:$16 sps:$4 sm:$0xff]   ;;  %v157_v37 = vlaneseq }
  0x5c   :  { %5164 = vset.pattern.permute.xlu0 %v5922_v0  ;;  %396 = vmatprep.mubr.bf16.mxu0 %v5922_v0  ;;  %v5177_v4 = vld [vmem:[#allocation2 + $0xec] ss:$16 sps:$4 sm:$0xff]   ;;  %v5179_v5 = vld [vmem:[#allocation2 + $0xe0] ss:$16 sps:$4 sm:$0xff]   ;;  %v5180_v6 = vld [vmem:[#allocation2 + $0xe8] ss:$16 sps:$4 sm:$0xff]  }
  0x5d   :  { %439 = vmatprep.mubr.bf16.mxu1 %v5922_v0  ;;  %364 = vmatprep.subr.bf16.mxu0 %v5175_v3  ;;  %v5181_v7 = vld [vmem:[#allocation2 + $0xc4] ss:$16 sps:$4 sm:$0xff]   ;;  %v5183_v8 = vld [vmem:[#allocation2 + $0xcc] ss:$16 sps:$4 sm:$0xff]   ;;  %v5185_v9 = vld [vmem:[#allocation2 + $0xc0] ss:$16 sps:$4 sm:$0xff]  }
  0x5e   :  { %407 = vmatprep.subr.bf16.mxu1 %v5177_v4  ;;  %365 = vmatpush1.bf16.msra.mxu0 %v5179_v5  ;;  %v5186_v10 = vld [vmem:[#allocation2 + $0xc8] ss:$16 sps:$4 sm:$0xff]   ;;  %v5187_v11 = vld [vmem:[#allocation2 + $0xa4] ss:$16 sps:$4 sm:$0xff]   ;;  %v5189_v12 = vld [vmem:[#allocation2 + $0xac] ss:$16 sps:$4 sm:$0xff]  }
  0x5f   :  { %408 = vmatpush1.bf16.msra.mxu1 %v5180_v6  ;;  %366 = vmatprep.subr.bf16.mxu0 %v5181_v7  ;;  %v5191_v13 = vld [vmem:[#allocation2 + $0xa0] ss:$16 sps:$4 sm:$0xff]   ;;  %v5192_v14 = vld [vmem:[#allocation2 + $0xa8] ss:$16 sps:$4 sm:$0xff]   ;;  %v5193_v15 = vld [vmem:[#allocation2 + $0x84] ss:$16 sps:$4 sm:$0xff]  }
  0x60   :  { %409 = vmatprep.subr.bf16.mxu1 %v5183_v8  ;;  %v5195_v16 = vld [vmem:[#allocation2 + $0x8c] ss:$16 sps:$4 sm:$0xff]   ;;  %v5197_v17 = vld [vmem:[#allocation2 + $0x80] ss:$16 sps:$4 sm:$0xff]   ;;  %v5198_v18 = vld [vmem:[#allocation2 + $0x88] ss:$16 sps:$4 sm:$0xff]  }
  0x61   :  { %v155_v1 = vld [vmem:[%s6401_s21] sm:$0xff]  ;;  %v156_v2 = vld [vmem:[%s6401_s21 + $0x8] sm:$0xff]  ;;  %v5225_v35 = vld [vmem:[#allocation4 + $0x74] ss:$8 sps:$4 sm:$0xff]   ;;  %v6059_v39 = vand.u32 127, %v157_v37  ;;  %vm5925_vm3 = vmmov 0  }
  0x62   :  { %160 = vperm.xlu0 %5164, %v155_v1   ;;  %367 = vmatpush1.bf16.msra.mxu0 %v5185_v9  ;;  %v5199_v19 = vld [vmem:[#allocation2 + $0x64] ss:$16 sps:$4 sm:$0xff]   ;;  %v5201_v20 = vld [vmem:[#allocation2 + $0x6c] ss:$16 sps:$4 sm:$0xff]   ;;  %v5203_v21 = vld [vmem:[#allocation2 + $0x60] ss:$16 sps:$4 sm:$0xff]  }
  0x63   :  { %410 = vmatpush1.bf16.msra.mxu1 %v5186_v10  ;;  %368 = vmatprep.subr.bf16.mxu0 %v5187_v11  ;;  %v5204_v22 = vld [vmem:[#allocation2 + $0x68] ss:$16 sps:$4 sm:$0xff]   ;;  %v5205_v23 = vld [vmem:[#allocation2 + $0x44] ss:$16 sps:$4 sm:$0xff]   ;;  %v5207_v24 = vld [vmem:[#allocation2 + $0x4c] ss:$16 sps:$4 sm:$0xff]  }
  0x64   :  { %411 = vmatprep.subr.bf16.mxu1 %v5189_v12  ;;  %v5209_v25 = vld [vmem:[#allocation2 + $0x40] ss:$16 sps:$4 sm:$0xff]   ;;  %v5210_v26 = vld [vmem:[#allocation2 + $0x48] ss:$16 sps:$4 sm:$0xff]   ;;  %v5211_v27 = vld [vmem:[#allocation2 + $0x24] ss:$16 sps:$4 sm:$0xff]  }
  0x65   :  { %v5213_v28 = vld [vmem:[#allocation2 + $0x2c] ss:$16 sps:$4 sm:$0xff]   ;;  %v5215_v29 = vld [vmem:[#allocation2 + $0x20] ss:$16 sps:$4 sm:$0xff]   ;;  %v5216_v30 = vld [vmem:[#allocation2 + $0x28] ss:$16 sps:$4 sm:$0xff]  }
  0x66   :  { %163 = vperm.xlu0 %5164, %v156_v2   ;;  %369 = vmatpush1.bf16.msra.mxu0 %v5191_v13  ;;  %v5217_v31 = vld [vmem:[#allocation2 + $0x4] ss:$16 sps:$4 sm:$0xff]   ;;  %v5219_v32 = vld [vmem:[#allocation2 + $0xc] ss:$16 sps:$4 sm:$0xff]   ;;  %v5221_v33 = vld [vmem:[#allocation2] ss:$16 sps:$4 sm:$0xff]  }
  0x67   :  { %412 = vmatpush1.bf16.msra.mxu1 %v5192_v14  ;;  %370 = vmatprep.subr.bf16.mxu0 %v5193_v15  ;;  %v5222_v34 = vld [vmem:[#allocation2 + $0x8] ss:$16 sps:$4 sm:$0xff]   ;;  %v5228_v36 = vld [vmem:[#allocation4 + $0x174] ss:$8 sps:$4 sm:$0xff]   ;;  %v5231_v42 = vld [vmem:[#allocation4 + $0x64] ss:$8 sps:$4 sm:$0xff]  }
  0x68   :  { %413 = vmatprep.subr.bf16.mxu1 %v5195_v16  ;;  %v5223_v40 = vld [vmem:[#allocation4 + $0x70] ss:$8 sps:$4 sm:$0xff]   ;;  %v5234_v43 = vld [vmem:[#allocation4 + $0x164] ss:$8 sps:$4 sm:$0xff]   ;;  %v5229_v45 = vld [vmem:[#allocation4 + $0x60] ss:$8 sps:$4 sm:$0xff]  }
  0x69   :  { %v5226_v41 = vld [vmem:[#allocation4 + $0x170] ss:$8 sps:$4 sm:$0xff]   ;;  %v5232_v46 = vld [vmem:[#allocation4 + $0x160] ss:$8 sps:$4 sm:$0xff]   ;;  %v5923_v47 = vmov 1.0|1.0  }
  0x6a   :  { %371 = vmatpush1.bf16.msra.mxu0 %v5197_v17  ;;  %v5237_v48 = vld [vmem:[#allocation4 + $0x54] ss:$8 sps:$4 sm:$0xff]   ;;  %v5235_v50 = vld [vmem:[#allocation4 + $0x50] ss:$8 sps:$4 sm:$0xff]   ;;  %v5243_v52 = vld [vmem:[#allocation4 + $0x44] ss:$8 sps:$4 sm:$0xff]  }
  0x6b   :  { %414 = vmatpush1.bf16.msra.mxu1 %v5198_v18  ;;  %372 = vmatprep.subr.bf16.mxu0 %v5199_v19  ;;  %v5240_v49 = vld [vmem:[#allocation4 + $0x154] ss:$8 sps:$4 sm:$0xff]   ;;  %v5238_v51 = vld [vmem:[#allocation4 + $0x150] ss:$8 sps:$4 sm:$0xff]   ;;  %v5246_v53 = vld [vmem:[#allocation4 + $0x144] ss:$8 sps:$4 sm:$0xff]  }
  0x6c   :  { %415 = vmatprep.subr.bf16.mxu1 %v5201_v20  ;;  %v5241_v54 = vld [vmem:[#allocation4 + $0x40] ss:$8 sps:$4 sm:$0xff]   ;;  %v5249_v56 = vld [vmem:[#allocation4 + $0x34] ss:$8 sps:$4 sm:$0xff]   ;;  %v5247_v58 = vld [vmem:[#allocation4 + $0x30] ss:$8 sps:$4 sm:$0xff]  }
  0x6d   :  { %v5244_v55 = vld [vmem:[#allocation4 + $0x140] ss:$8 sps:$4 sm:$0xff]   ;;  %v5252_v57 = vld [vmem:[#allocation4 + $0x134] ss:$8 sps:$4 sm:$0xff]   ;;  %v5250_v59 = vld [vmem:[#allocation4 + $0x130] ss:$8 sps:$4 sm:$0xff]  }
  0x6e   :  { %373 = vmatpush1.bf16.msra.mxu0 %v5203_v21  ;;  %v5255_v60 = vld [vmem:[#allocation4 + $0x24] ss:$8 sps:$4 sm:$0xff]   ;;  %v5253_v62 = vld [vmem:[#allocation4 + $0x20] ss:$8 sps:$4 sm:$0xff]   ;;  %v5261_v0 = vld [vmem:[#allocation4 + $0x14] ss:$8 sps:$4 sm:$0xff]  }
  0x6f   :  { %416 = vmatpush1.bf16.msra.mxu1 %v5204_v22  ;;  %374 = vmatprep.subr.bf16.mxu0 %v5205_v23  ;;  %v5258_v61 = vld [vmem:[#allocation4 + $0x124] ss:$8 sps:$4 sm:$0xff]   ;;  %v5256_v63 = vld [vmem:[#allocation4 + $0x120] ss:$8 sps:$4 sm:$0xff]   ;;  %v5264_v1 = vld [vmem:[#allocation4 + $0x114] ss:$8 sps:$4 sm:$0xff]  }
  0x70   :  { %417 = vmatprep.subr.bf16.mxu1 %v5207_v24  ;;  %v5259_v2 = vld [vmem:[#allocation4 + $0x10] ss:$8 sps:$4 sm:$0xff]   ;;  %v5267_v4 = vld [vmem:[#allocation4 + $0x4] ss:$8 sps:$4 sm:$0xff]   ;;  %v5265_v6 = vld [vmem:[#allocation4] ss:$8 sps:$4 sm:$0xff]  }
  0x71   :  { %v5262_v3 = vld [vmem:[#allocation4 + $0x110] ss:$8 sps:$4 sm:$0xff]   ;;  %v5270_v5 = vld [vmem:[#allocation4 + $0x104] ss:$8 sps:$4 sm:$0xff]   ;;  %v5268_v7 = vld [vmem:[#allocation4 + $0x100] ss:$8 sps:$4 sm:$0xff]  }
  0x72   :  { %375 = vmatpush1.bf16.msra.mxu0 %v5209_v25  ;;  %v5273_v8 = vld [vmem:[#allocation4 + $0xf4] ss:$8 sps:$4 sm:$0xff]   ;;  %v5271_v10 = vld [vmem:[#allocation4 + $0xf0] ss:$8 sps:$4 sm:$0xff]   ;;  %v5279_v12 = vld [vmem:[#allocation4 + $0xe4] ss:$8 sps:$4 sm:$0xff]  }
  0x73   :  { %418 = vmatpush1.bf16.msra.mxu1 %v5210_v26  ;;  %376 = vmatprep.subr.bf16.mxu0 %v5211_v27  ;;  %v5276_v9 = vld [vmem:[#allocation4 + $0x1f4] ss:$8 sps:$4 sm:$0xff]   ;;  %v5274_v11 = vld [vmem:[#allocation4 + $0x1f0] ss:$8 sps:$4 sm:$0xff]   ;;  %v5282_v13 = vld [vmem:[#allocation4 + $0x1e4] ss:$8 sps:$4 sm:$0xff]  }
  0x74   :  { %419 = vmatprep.subr.bf16.mxu1 %v5213_v28  ;;  %v5277_v14 = vld [vmem:[#allocation4 + $0xe0] ss:$8 sps:$4 sm:$0xff]   ;;  %v5285_v16 = vld [vmem:[#allocation4 + $0xd4] ss:$8 sps:$4 sm:$0xff]   ;;  %v5283_v18 = vld [vmem:[#allocation4 + $0xd0] ss:$8 sps:$4 sm:$0xff]  }
  0x75   :  { %v5280_v15 = vld [vmem:[#allocation4 + $0x1e0] ss:$8 sps:$4 sm:$0xff]   ;;  %v5288_v17 = vld [vmem:[#allocation4 + $0x1d4] ss:$8 sps:$4 sm:$0xff]   ;;  %v5286_v19 = vld [vmem:[#allocation4 + $0x1d0] ss:$8 sps:$4 sm:$0xff]  }
  0x76   :  { %377 = vmatpush1.bf16.msra.mxu0 %v5215_v29  ;;  %v5291_v20 = vld [vmem:[#allocation4 + $0xc4] ss:$8 sps:$4 sm:$0xff]   ;;  %v5289_v22 = vld [vmem:[#allocation4 + $0xc0] ss:$8 sps:$4 sm:$0xff]   ;;  %v5297_v24 = vld [vmem:[#allocation4 + $0xb4] ss:$8 sps:$4 sm:$0xff]  }
  0x77   :  { %420 = vmatpush1.bf16.msra.mxu1 %v5216_v30  ;;  %378 = vmatprep.subr.bf16.mxu0 %v5217_v31  ;;  %v5294_v21 = vld [vmem:[#allocation4 + $0x1c4] ss:$8 sps:$4 sm:$0xff]   ;;  %v5292_v23 = vld [vmem:[#allocation4 + $0x1c0] ss:$8 sps:$4 sm:$0xff]   ;;  %v5300_v25 = vld [vmem:[#allocation4 + $0x1b4] ss:$8 sps:$4 sm:$0xff]  }
  0x78   :  { %421 = vmatprep.subr.bf16.mxu1 %v5219_v32  ;;  %v5295_v26 = vld [vmem:[#allocation4 + $0xb0] ss:$8 sps:$4 sm:$0xff]   ;;  %v5303_v28 = vld [vmem:[#allocation4 + $0xa4] ss:$8 sps:$4 sm:$0xff]   ;;  %v5301_v30 = vld [vmem:[#allocation4 + $0xa0] ss:$8 sps:$4 sm:$0xff]  }
  0x79   :  { %v5298_v27 = vld [vmem:[#allocation4 + $0x1b0] ss:$8 sps:$4 sm:$0xff]   ;;  %v5306_v29 = vld [vmem:[#allocation4 + $0x1a4] ss:$8 sps:$4 sm:$0xff]   ;;  %v5304_v31 = vld [vmem:[#allocation4 + $0x1a0] ss:$8 sps:$4 sm:$0xff]  }
  0x7a   :  { %379 = vmatpush1.bf16.msra.mxu0 %v5221_v33  ;;  %v5309_v32 = vld [vmem:[#allocation4 + $0x94] ss:$8 sps:$4 sm:$0xff]   ;;  %vm1715_vm4 = vcmask 523264   ;;  %vm2316_vm5 = vcmask 64512   ;;  %vm4601_vm10 = vcmask 7168  }
  0x7b   :  { %422 = vmatpush1.bf16.msra.mxu1 %v5222_v34  ;;  %850 = vmatprep.subr.bf16.mxu0 %v5225_v35  ;;  %v5312_v33 = vld [vmem:[#allocation4 + $0x194] ss:$8 sps:$4 sm:$0xff]   ;;  %v5307_v34 = vld [vmem:[#allocation4 + $0x90] ss:$8 sps:$4 sm:$0xff]  }
  0x7c   :  { %893 = vmatprep.subr.bf16.mxu1 %v5228_v36  ;;  %v5310_v35 = vld [vmem:[#allocation4 + $0x190] ss:$8 sps:$4 sm:$0xff]   ;;  %v5315_v36 = vld [vmem:[#allocation4 + $0x84] ss:$8 sps:$4 sm:$0xff]  }
  0xdd   :  { %v6056_v38 = vpop.permute.xlu0 %160 }
  0xde   :  { %vm165_vm0 = vcmp.eq.s32.totalorder %v6056_v38, %v6059_v39 }
  0xe1   :  { %v6061_v44 = vpop.permute.xlu0 %163 }
  0xe2   :  { %vm166_vm1 = vcmp.eq.s32.totalorder %v6061_v44, %v6059_v39 }
  0xe3   :  { %vm4646_vm2 = vmpackc.low %vm166_vm1, %vm165_vm0 }
  0xe4   :  { %4647 = vmatmul.mubr.msk.bf16.vlgmr.msra.gmra.mxu0 %vm4646_vm2, %v5923_v47  ;;  %4649 = vmatmul.mubr.msk.bf16.vlgmr.msra.gmra.mxu1 %vm4646_vm2, %v5923_v47 }
  0xe5   :  { %851 = vmatpush1.bf16.msra.mxu0 %v5223_v40  ;;  %894 = vmatpush1.bf16.msra.mxu1 %v5226_v41  ;;  %v5318_v40 = vld [vmem:[#allocation4 + $0x184] ss:$8 sps:$4 sm:$0xff]   ;;  %v5313_v41 = vld [vmem:[#allocation4 + $0x80] ss:$8 sps:$4 sm:$0xff]  }
  0xe6   :  { %852 = vmatprep.subr.bf16.mxu0 %v5231_v42  ;;  %895 = vmatprep.subr.bf16.mxu1 %v5234_v43  ;;  %v5316_v42 = vld [vmem:[#allocation4 + $0x180] ss:$8 sps:$4 sm:$0xff]   ;;  %v5321_v43 = vld [vmem:[#allocation6 + $0x154] ss:$24 sps:$4 sm:$0xff]  }
  0xe9   :  { %853 = vmatpush1.bf16.msra.mxu0 %v5229_v45  ;;  %896 = vmatpush1.bf16.msra.mxu1 %v5232_v46  ;;  %v5324_v45 = vld [vmem:[#allocation6 + $0x15c] ss:$24 sps:$4 sm:$0xff]  }
  0xea   :  { %854 = vmatprep.subr.bf16.mxu0 %v5237_v48  ;;  %897 = vmatprep.subr.bf16.mxu1 %v5240_v49 }
  0xed   :  { %855 = vmatpush1.bf16.msra.mxu0 %v5235_v50  ;;  %898 = vmatpush1.bf16.msra.mxu1 %v5238_v51 }
  0xee   :  { %856 = vmatprep.subr.bf16.mxu0 %v5243_v52  ;;  %899 = vmatprep.subr.bf16.mxu1 %v5246_v53 }
  0xf1   :  { %857 = vmatpush1.bf16.msra.mxu0 %v5241_v54  ;;  %900 = vmatpush1.bf16.msra.mxu1 %v5244_v55 }
  0xf2   :  { %858 = vmatprep.subr.bf16.mxu0 %v5249_v56  ;;  %901 = vmatprep.subr.bf16.mxu1 %v5252_v57  ;;  %v5319_v56 = vld [vmem:[#allocation6 + $0x150] ss:$24 sps:$4 sm:$0xff]  }
  0xf3   :  { %v5322_v57 = vld [vmem:[#allocation6 + $0x158] ss:$24 sps:$4 sm:$0xff]  }
  0xf5   :  { %859 = vmatpush1.bf16.msra.mxu0 %v5247_v58  ;;  %902 = vmatpush1.bf16.msra.mxu1 %v5250_v59 }
  0xf6   :  { %860 = vmatprep.subr.bf16.mxu0 %v5255_v60  ;;  %903 = vmatprep.subr.bf16.mxu1 %v5258_v61  ;;  %v5327_v60 = vld [vmem:[#allocation6 + $0x124] ss:$24 sps:$4 sm:$0xff]  }
  0xf7   :  { %v5330_v61 = vld [vmem:[#allocation6 + $0x12c] ss:$24 sps:$4 sm:$0xff]  }
  0xf9   :  { %861 = vmatpush1.bf16.msra.mxu0 %v5253_v62  ;;  %904 = vmatpush1.bf16.msra.mxu1 %v5256_v63  ;;  %v5325_v62 = vld [vmem:[#allocation6 + $0x120] ss:$24 sps:$4 sm:$0xff]  }
  0xfa   :  { %862 = vmatprep.subr.bf16.mxu0 %v5261_v0  ;;  %905 = vmatprep.subr.bf16.mxu1 %v5264_v1  ;;  %v5328_v63 = vld [vmem:[#allocation6 + $0x128] ss:$24 sps:$4 sm:$0xff]   ;;  %v5333_v0 = vld [vmem:[#allocation6 + $0xf4] ss:$24 sps:$4 sm:$0xff]  }
  0xfb   :  { %v5336_v1 = vld [vmem:[#allocation6 + $0xfc] ss:$24 sps:$4 sm:$0xff]  }
  0xfd   :  { %863 = vmatpush1.bf16.msra.mxu0 %v5259_v2  ;;  %906 = vmatpush1.bf16.msra.mxu1 %v5262_v3  ;;  %v5331_v2 = vld [vmem:[#allocation6 + $0xf0] ss:$24 sps:$4 sm:$0xff]  }
  0xfe   :  { %864 = vmatprep.subr.bf16.mxu0 %v5267_v4  ;;  %907 = vmatprep.subr.bf16.mxu1 %v5270_v5  ;;  %v5334_v3 = vld [vmem:[#allocation6 + $0xf8] ss:$24 sps:$4 sm:$0xff]   ;;  %v5339_v4 = vld [vmem:[#allocation6 + $0xc4] ss:$24 sps:$4 sm:$0xff]  }
  0xff   :  { %v5342_v5 = vld [vmem:[#allocation6 + $0xcc] ss:$24 sps:$4 sm:$0xff]  }
 0x101   :  { %865 = vmatpush1.bf16.msra.mxu0 %v5265_v6  ;;  %908 = vmatpush1.bf16.msra.mxu1 %v5268_v7  ;;  %v5337_v6 = vld [vmem:[#allocation6 + $0xc0] ss:$24 sps:$4 sm:$0xff]  }
 0x102   :  { %866 = vmatprep.subr.bf16.mxu0 %v5273_v8  ;;  %909 = vmatprep.subr.bf16.mxu1 %v5276_v9  ;;  %v5340_v7 = vld [vmem:[#allocation6 + $0xc8] ss:$24 sps:$4 sm:$0xff]   ;;  %v5345_v8 = vld [vmem:[#allocation6 + $0x94] ss:$24 sps:$4 sm:$0xff]  }
 0x103   :  { %v5348_v9 = vld [vmem:[#allocation6 + $0x9c] ss:$24 sps:$4 sm:$0xff]  }
 0x105   :  { %867 = vmatpush2.bf16.msra.mxu0 %v5271_v10  ;;  %910 = vmatpush2.bf16.msra.mxu1 %v5274_v11  ;;  %v5343_v10 = vld [vmem:[#allocation6 + $0x90] ss:$24 sps:$4 sm:$0xff]  }
 0x106   :  { %868 = vmatprep.subr.bf16.mxu0 %v5279_v12  ;;  %911 = vmatprep.subr.bf16.mxu1 %v5282_v13  ;;  %v5346_v11 = vld [vmem:[#allocation6 + $0x98] ss:$24 sps:$4 sm:$0xff]   ;;  %v5351_v12 = vld [vmem:[#allocation6 + $0x64] ss:$24 sps:$4 sm:$0xff]  }
 0x107   :  { %v5354_v13 = vld [vmem:[#allocation6 + $0x6c] ss:$24 sps:$4 sm:$0xff]  }
 0x109   :  { %869 = vmatpush2.bf16.msra.mxu0 %v5277_v14  ;;  %912 = vmatpush2.bf16.msra.mxu1 %v5280_v15  ;;  %v5349_v14 = vld [vmem:[#allocation6 + $0x60] ss:$24 sps:$4 sm:$0xff]  }
 0x10a   :  { %870 = vmatprep.subr.bf16.mxu0 %v5285_v16  ;;  %913 = vmatprep.subr.bf16.mxu1 %v5288_v17  ;;  %v5352_v15 = vld [vmem:[#allocation6 + $0x68] ss:$24 sps:$4 sm:$0xff]   ;;  %v5357_v16 = vld [vmem:[#allocation6 + $0x34] ss:$24 sps:$4 sm:$0xff]  }
 0x10b   :  { %v5360_v17 = vld [vmem:[#allocation6 + $0x3c] ss:$24 sps:$4 sm:$0xff]  }
 0x10d   :  { %871 = vmatpush2.bf16.msra.mxu0 %v5283_v18  ;;  %914 = vmatpush2.bf16.msra.mxu1 %v5286_v19  ;;  %v5355_v18 = vld [vmem:[#allocation6 + $0x30] ss:$24 sps:$4 sm:$0xff]  }
 0x10e   :  { %872 = vmatprep.subr.bf16.mxu0 %v5291_v20  ;;  %915 = vmatprep.subr.bf16.mxu1 %v5294_v21  ;;  %v5358_v19 = vld [vmem:[#allocation6 + $0x38] ss:$24 sps:$4 sm:$0xff]   ;;  %v5363_v20 = vld [vmem:[#allocation6 + $0x4] ss:$24 sps:$4 sm:$0xff]  }
 0x10f   :  { %v5366_v21 = vld [vmem:[#allocation6 + $0xc] ss:$24 sps:$4 sm:$0xff]  }
 0x111   :  { %873 = vmatpush2.bf16.msra.mxu0 %v5289_v22  ;;  %916 = vmatpush2.bf16.msra.mxu1 %v5292_v23  ;;  %v5361_v22 = vld [vmem:[#allocation6] ss:$24 sps:$4 sm:$0xff]  }
 0x112   :  { %874 = vmatprep.subr.bf16.mxu0 %v5297_v24  ;;  %917 = vmatprep.subr.bf16.mxu1 %v5300_v25  ;;  %v5364_v23 = vld [vmem:[#allocation6 + $0x8] ss:$24 sps:$4 sm:$0xff]   ;;  %v5369_v24 = vld [vmem:[#allocation6 + $0x2d4] ss:$24 sps:$4 sm:$0xff]  }
 0x113   :  { %v5372_v25 = vld [vmem:[#allocation6 + $0x2dc] ss:$24 sps:$4 sm:$0xff]  }
 0x115   :  { %875 = vmatpush2.bf16.msra.mxu0 %v5295_v26  ;;  %918 = vmatpush2.bf16.msra.mxu1 %v5298_v27  ;;  %v5367_v26 = vld [vmem:[#allocation6 + $0x2d0] ss:$24 sps:$4 sm:$0xff]  }
 0x116   :  { %876 = vmatprep.subr.bf16.mxu0 %v5303_v28  ;;  %919 = vmatprep.subr.bf16.mxu1 %v5306_v29  ;;  %v5370_v27 = vld [vmem:[#allocation6 + $0x2d8] ss:$24 sps:$4 sm:$0xff]   ;;  %v5375_v28 = vld [vmem:[#allocation6 + $0x2a4] ss:$24 sps:$4 sm:$0xff]  }
 0x117   :  { %v5378_v29 = vld [vmem:[#allocation6 + $0x2ac] ss:$24 sps:$4 sm:$0xff]  }
 0x119   :  { %877 = vmatpush2.bf16.msra.mxu0 %v5301_v30  ;;  %920 = vmatpush2.bf16.msra.mxu1 %v5304_v31  ;;  %v5373_v30 = vld [vmem:[#allocation6 + $0x2a0] ss:$24 sps:$4 sm:$0xff]  }
 0x11a   :  { %878 = vmatprep.subr.bf16.mxu0 %v5309_v32  ;;  %921 = vmatprep.subr.bf16.mxu1 %v5312_v33  ;;  %v5376_v31 = vld [vmem:[#allocation6 + $0x2a8] ss:$24 sps:$4 sm:$0xff]   ;;  %v5381_v32 = vld [vmem:[#allocation6 + $0x274] ss:$24 sps:$4 sm:$0xff]  }
 0x11b   :  { %v5384_v33 = vld [vmem:[#allocation6 + $0x27c] ss:$24 sps:$4 sm:$0xff]  }
 0x11d   :  { %879 = vmatpush2.bf16.msra.mxu0 %v5307_v34  ;;  %922 = vmatpush2.bf16.msra.mxu1 %v5310_v35  ;;  %v5379_v34 = vld [vmem:[#allocation6 + $0x270] ss:$24 sps:$4 sm:$0xff]  }
 0x11e   :  { %880 = vmatprep.subr.bf16.mxu0 %v5315_v36  ;;  %923 = vmatprep.subr.bf16.mxu1 %v5318_v40  ;;  %v5382_v35 = vld [vmem:[#allocation6 + $0x278] ss:$24 sps:$4 sm:$0xff]   ;;  %v5387_v36 = vld [vmem:[#allocation6 + $0x244] ss:$24 sps:$4 sm:$0xff]  }
 0x11f   :  { %v5390_v40 = vld [vmem:[#allocation6 + $0x24c] ss:$24 sps:$4 sm:$0xff]  }
 0x121   :  { %881 = vmatpush2.bf16.msra.mxu0 %v5313_v41  ;;  %924 = vmatpush2.bf16.msra.mxu1 %v5316_v42  ;;  %v5385_v41 = vld [vmem:[#allocation6 + $0x240] ss:$24 sps:$4 sm:$0xff]  }
 0x122   :  { %1546 = vmatprep.subr.bf16.mxu0 %v5321_v43  ;;  %1589 = vmatprep.subr.bf16.mxu1 %v5324_v45  ;;  %v5388_v42 = vld [vmem:[#allocation6 + $0x248] ss:$24 sps:$4 sm:$0xff]   ;;  %v5393_v43 = vld [vmem:[#allocation6 + $0x214] ss:$24 sps:$4 sm:$0xff]  }
 0x123   :  { %v5396_v45 = vld [vmem:[#allocation6 + $0x21c] ss:$24 sps:$4 sm:$0xff]  }
 0x1a4   :  { %v398_v46 = vpop.f32.mrf.mxu0  ;;  %v441_v47 = vpop.f32.mrf.mxu1 }
 0x1a6   :  { %v400_v48 = vpop.f32.mrf.mxu0  ;;  %v443_v49 = vpop.f32.mrf.mxu1 }
 0x1a8   :  { %v402_v50 = vpop.f32.mrf.mxu0  ;;  %v445_v51 = vpop.f32.mrf.mxu1 }
 0x1a9   :  { %v450_v58 = vpack.c.bf16 %v402_v50, %v398_v46  ;;  %v452_v59 = vpack.c.bf16 %v445_v51, %v441_v47  ;;  %v5391_v46 = vld [vmem:[#allocation6 + $0x210] ss:$24 sps:$4 sm:$0xff]   ;;  %v5402_v50 = vld [vmem:[#allocation6 + $0x1ec] ss:$24 sps:$4 sm:$0xff]  }
 0x1aa   :  { %v404_v52 = vpop.f32.mrf.mxu0  ;;  %v447_v53 = vpop.f32.mrf.mxu1  ;;  %v5394_v47 = vld [vmem:[#allocation6 + $0x218] ss:$24 sps:$4 sm:$0xff]   ;;  %v5400_v51 = vld [vmem:[#allocation6 + $0x1e8] ss:$24 sps:$4 sm:$0xff]  }
 0x1ab   :  { %v451_v54 = vpack.c.bf16 %v404_v52, %v400_v48  ;;  %v453_v55 = vpack.c.bf16 %v447_v53, %v443_v49  ;;  %v5399_v48 = vld [vmem:[#allocation6 + $0x1e4] ss:$24 sps:$4 sm:$0xff]   ;;  %v5397_v49 = vld [vmem:[#allocation6 + $0x1e0] ss:$24 sps:$4 sm:$0xff]   ;;  %v5405_v52 = vld [vmem:[#allocation6 + $0x1b4] ss:$24 sps:$4 sm:$0xff]  }
 0x1ac   :  { %v5403_v53 = vld [vmem:[#allocation6 + $0x1b0] ss:$24 sps:$4 sm:$0xff]  }
 0x1ad   :  { %882 = vmatprep.mubr.bf16.mxu0 %v451_v54  ;;  %925 = vmatprep.mubr.bf16.mxu1 %v453_v55  ;;  %v5408_v54 = vld [vmem:[#allocation6 + $0x1bc] ss:$24 sps:$4 sm:$0xff]   ;;  %v5406_v55 = vld [vmem:[#allocation6 + $0x1b8] ss:$24 sps:$4 sm:$0xff]  }
 0x1ae   :  { %883 = vmatmul.mubr.bf16.vlgmr.msra.gmra.mxu0 %v450_v58  ;;  %926 = vmatmul.mubr.bf16.vlgmr.msra.gmra.mxu1 %v452_v59  ;;  %v5414_v58 = vld [vmem:[#allocation6 + $0x18c] ss:$24 sps:$4 sm:$0xff]   ;;  %v5412_v59 = vld [vmem:[#allocation6 + $0x188] ss:$24 sps:$4 sm:$0xff]  }
 0x1af   :  { %1547 = vmatpush1.bf16.msra.mxu0 %v5319_v56  ;;  %1590 = vmatpush1.bf16.msra.mxu1 %v5322_v57  ;;  %v5411_v56 = vld [vmem:[#allocation6 + $0x184] ss:$24 sps:$4 sm:$0xff]   ;;  %v5409_v57 = vld [vmem:[#allocation6 + $0x180] ss:$24 sps:$4 sm:$0xff]  }
 0x1b0   :  { %1548 = vmatprep.subr.bf16.mxu0 %v5327_v60  ;;  %1591 = vmatprep.subr.bf16.mxu1 %v5330_v61  ;;  %v5417_v60 = vld [vmem:[#allocation6 + $0x164] ss:$24 sps:$4 sm:$0xff]   ;;  %v5924_v61 = vmov 0.0  }
 0x1b3   :  { %1549 = vmatpush1.bf16.msra.mxu0 %v5325_v62  ;;  %1592 = vmatpush1.bf16.msra.mxu1 %v5328_v63  ;;  %v6075_v62 = vshrl.u32 %v157_v37, 7 }
 0x1b4   :  { %1550 = vmatprep.subr.bf16.mxu0 %v5333_v0  ;;  %1593 = vmatprep.subr.bf16.mxu1 %v5336_v1  ;;  %v518_v1 = vld [vmem:[%s6379_s3] sm:$0x3] }
 0x1b5   :  { %v6078_v63 = vsub.s32 1, %v6075_v62  ;;  %v6081_v0 = vsub.s32 0, %v6075_v62 }
 0x1b7   :  { %1551 = vmatpush1.bf16.msra.mxu0 %v5331_v2  ;;  %1594 = vmatpush1.bf16.msra.mxu1 %v5334_v3 }
 0x1b8   :  { %1552 = vmatprep.subr.bf16.mxu0 %v5339_v4  ;;  %1595 = vmatprep.subr.bf16.mxu1 %v5342_v5  ;;  %v527_v4 = vrot.slane %v518_v1, %v6078_v63  ;;  %v523_v5 = vrot.slane %v518_v1, %v6081_v0 }
 0x1bb   :  { %1553 = vmatpush1.bf16.msra.mxu0 %v5337_v6  ;;  %1596 = vmatpush1.bf16.msra.mxu1 %v5340_v7 }
 0x1bc   :  { %1554 = vmatprep.subr.bf16.mxu0 %v5345_v8  ;;  %1597 = vmatprep.subr.bf16.mxu1 %v5348_v9 }
 0x1bf   :  { %1555 = vmatpush1.bf16.msra.mxu0 %v5343_v10  ;;  %1598 = vmatpush1.bf16.msra.mxu1 %v5346_v11 }
 0x1c0   :  { %1556 = vmatprep.subr.bf16.mxu0 %v5351_v12  ;;  %1599 = vmatprep.subr.bf16.mxu1 %v5354_v13 }
 0x1c3   :  { %1557 = vmatpush1.bf16.msra.mxu0 %v5349_v14  ;;  %1600 = vmatpush1.bf16.msra.mxu1 %v5352_v15 }
 0x1c4   :  { %1558 = vmatprep.subr.bf16.mxu0 %v5357_v16  ;;  %1601 = vmatprep.subr.bf16.mxu1 %v5360_v17 }
 0x1c7   :  { %1559 = vmatpush1.bf16.msra.mxu0 %v5355_v18  ;;  %1602 = vmatpush1.bf16.msra.mxu1 %v5358_v19 }
 0x1c8   :  { %1560 = vmatprep.subr.bf16.mxu0 %v5363_v20  ;;  %1603 = vmatprep.subr.bf16.mxu1 %v5366_v21  ;;  %v5415_v20 = vld [vmem:[#allocation6 + $0x160] ss:$24 sps:$4 sm:$0xff]  }
 0x1cb   :  { %1561 = vmatpush1.bf16.msra.mxu0 %v5361_v22  ;;  %1604 = vmatpush1.bf16.msra.mxu1 %v5364_v23  ;;  %v5420_v22 = vld [vmem:[#allocation6 + $0x134] ss:$24 sps:$4 sm:$0xff]   ;;  %v5418_v23 = vld [vmem:[#allocation6 + $0x130] ss:$24 sps:$4 sm:$0xff]  }
 0x1cc   :  { %1562 = vmatprep.subr.bf16.mxu0 %v5369_v24  ;;  %1605 = vmatprep.subr.bf16.mxu1 %v5372_v25  ;;  %v5423_v24 = vld [vmem:[#allocation6 + $0x104] ss:$24 sps:$4 sm:$0xff]   ;;  %v5421_v25 = vld [vmem:[#allocation6 + $0x100] ss:$24 sps:$4 sm:$0xff]  }
 0x1cf   :  { %1563 = vmatpush2.bf16.msra.mxu0 %v5367_v26  ;;  %1606 = vmatpush2.bf16.msra.mxu1 %v5370_v27  ;;  %v5426_v26 = vld [vmem:[#allocation6 + $0xd4] ss:$24 sps:$4 sm:$0xff]   ;;  %v5424_v27 = vld [vmem:[#allocation6 + $0xd0] ss:$24 sps:$4 sm:$0xff]  }
 0x1d0   :  { %1564 = vmatprep.subr.bf16.mxu0 %v5375_v28  ;;  %1607 = vmatprep.subr.bf16.mxu1 %v5378_v29  ;;  %v5429_v28 = vld [vmem:[#allocation6 + $0xa4] ss:$24 sps:$4 sm:$0xff]   ;;  %v5427_v29 = vld [vmem:[#allocation6 + $0xa0] ss:$24 sps:$4 sm:$0xff]  }
 0x1d3   :  { %1565 = vmatpush2.bf16.msra.mxu0 %v5373_v30  ;;  %1608 = vmatpush2.bf16.msra.mxu1 %v5376_v31  ;;  %v5432_v30 = vld [vmem:[#allocation6 + $0x74] ss:$24 sps:$4 sm:$0xff]   ;;  %v5430_v31 = vld [vmem:[#allocation6 + $0x70] ss:$24 sps:$4 sm:$0xff]  }
 0x1d4   :  { %1566 = vmatprep.subr.bf16.mxu0 %v5381_v32  ;;  %1609 = vmatprep.subr.bf16.mxu1 %v5384_v33  ;;  %v5435_v32 = vld [vmem:[#allocation6 + $0x44] ss:$24 sps:$4 sm:$0xff]   ;;  %v5433_v33 = vld [vmem:[#allocation6 + $0x40] ss:$24 sps:$4 sm:$0xff]  }
 0x1d7   :  { %1567 = vmatpush2.bf16.msra.mxu0 %v5379_v34  ;;  %1610 = vmatpush2.bf16.msra.mxu1 %v5382_v35  ;;  %v5438_v34 = vld [vmem:[#allocation6 + $0x14] ss:$24 sps:$4 sm:$0xff]   ;;  %v5436_v35 = vld [vmem:[#allocation6 + $0x10] ss:$24 sps:$4 sm:$0xff]  }
 0x1d8   :  { %1568 = vmatprep.subr.bf16.mxu0 %v5387_v36  ;;  %1611 = vmatprep.subr.bf16.mxu1 %v5390_v40  ;;  %v5441_v36 = vld [vmem:[#allocation6 + $0x2e4] ss:$24 sps:$4 sm:$0xff]   ;;  %v5439_v40 = vld [vmem:[#allocation6 + $0x2e0] ss:$24 sps:$4 sm:$0xff]  }
 0x1db   :  { %1569 = vmatpush2.bf16.msra.mxu0 %v5385_v41  ;;  %1612 = vmatpush2.bf16.msra.mxu1 %v5388_v42  ;;  %v5444_v41 = vld [vmem:[#allocation6 + $0x2b4] ss:$24 sps:$4 sm:$0xff]   ;;  %v5442_v42 = vld [vmem:[#allocation6 + $0x2b0] ss:$24 sps:$4 sm:$0xff]  }
 0x1dc   :  { %1570 = vmatprep.subr.bf16.mxu0 %v5393_v43  ;;  %1613 = vmatprep.subr.bf16.mxu1 %v5396_v45  ;;  %v5447_v43 = vld [vmem:[#allocation6 + $0x284] ss:$24 sps:$4 sm:$0xff]   ;;  %v5445_v45 = vld [vmem:[#allocation6 + $0x280] ss:$24 sps:$4 sm:$0xff]  }
 0x1df   :  { %1571 = vmatpush2.bf16.msra.mxu0 %v5391_v46  ;;  %1614 = vmatpush2.bf16.msra.mxu1 %v5394_v47  ;;  %v5450_v46 = vld [vmem:[#allocation6 + $0x254] ss:$24 sps:$4 sm:$0xff]   ;;  %v5448_v47 = vld [vmem:[#allocation6 + $0x250] ss:$24 sps:$4 sm:$0xff]  }
 0x1e0   :  { %1572 = vmatprep.subr.bf16.mxu0 %v5399_v48  ;;  %1615 = vmatprep.subr.bf16.mxu1 %v5402_v50  ;;  %v5453_v48 = vld [vmem:[#allocation6 + $0x224] ss:$24 sps:$4 sm:$0xff]   ;;  %v5456_v50 = vld [vmem:[#allocation6 + $0x1f4] ss:$24 sps:$4 sm:$0xff]  }
 0x1e3   :  { %1573 = vmatpush2.bf16.msra.mxu0 %v5397_v49  ;;  %1616 = vmatpush2.bf16.msra.mxu1 %v5400_v51  ;;  %v5451_v49 = vld [vmem:[#allocation6 + $0x220] ss:$24 sps:$4 sm:$0xff]   ;;  %v5454_v51 = vld [vmem:[#allocation6 + $0x1f0] ss:$24 sps:$4 sm:$0xff]  }
 0x1e4   :  { %1574 = vmatprep.subr.bf16.mxu0 %v5405_v52  ;;  %1617 = vmatprep.subr.bf16.mxu1 %v5408_v54  ;;  %v5459_v52 = vld [vmem:[#allocation6 + $0x1c4] ss:$24 sps:$4 sm:$0xff]   ;;  %v5462_v54 = vld [vmem:[#allocation6 + $0x194] ss:$24 sps:$4 sm:$0xff]  }
 0x1e7   :  { %1575 = vmatpush2.bf16.msra.mxu0 %v5403_v53  ;;  %1618 = vmatpush2.bf16.msra.mxu1 %v5406_v55  ;;  %v5457_v53 = vld [vmem:[#allocation6 + $0x1c0] ss:$24 sps:$4 sm:$0xff]   ;;  %v5460_v55 = vld [vmem:[#allocation6 + $0x190] ss:$24 sps:$4 sm:$0xff]  }
 0x1e8   :  { %1576 = vmatprep.subr.bf16.mxu0 %v5411_v56  ;;  %1619 = vmatprep.subr.bf16.mxu1 %v5414_v58  ;;  %v1046_v56 = vsub.s32 2, %v6075_v62  ;;  %v1050_v58 = vsub.s32 3, %v6075_v62 }
 0x1eb   :  { %1577 = vmatpush2.bf16.msra.mxu0 %v5409_v57  ;;  %1620 = vmatpush2.bf16.msra.mxu1 %v5412_v59  ;;  %v6111_v57 = vld [vmem:[%s6381_s5] sm:$0x3f] }
 0x1ec   :  { %5065 = vmatprep.subr.mxu1 %v5924_v61  ;;  %1632 = vmatprep.subr.bf16.mxu0 %v5417_v60  ;;  %v1047_v59 = vrot.slane %v6111_v57, %v1046_v56  ;;  %v1051_v60 = vrot.slane %v6111_v57, %v1050_v58  ;;  %v1039_v1 = vrot.slane %v6111_v57, %v6081_v0 }
 0x26e   :  { %v884_v2 = vpop.f32.mrf.mxu0  ;;  %v927_v3 = vpop.f32.mrf.mxu1 }
 0x26f   :  { %v885_v11 = vadd.f32 %v884_v2, %v523_v5 }
 0x270   :  { %v886_v6 = vpop.f32.mrf.mxu0  ;;  %v929_v7 = vpop.f32.mrf.mxu1 }
 0x271   :  { %v887_v9 = vadd.f32 %v886_v6, %v527_v4  ;;  %v6094_v18 = vadd.f32 %v927_v3, %v885_v11 }
 0x272   :  { %v888_v37 = vpop.f32.mrf.mxu0  ;;  %v931_v8 = vpop.f32.mrf.mxu1 }
 0x273   :  { %v889_v10 = vadd.f32 %v888_v37, %v523_v5  ;;  %v6090_v16 = vadd.f32 %v929_v7, %v887_v9 }
 0x274   :  { %v890_v12 = vpop.f32.mrf.mxu0  ;;  %v933_v15 = vpop.f32.mrf.mxu1 }
 0x275   :  { %v891_v13 = vadd.f32 %v890_v12, %v527_v4  ;;  %v6088_v14 = vadd.f32 %v931_v8, %v889_v10  ;;  %v1043_v8 = vrot.slane %v6111_v57, %v6078_v63 }
 0x277   :  { %v6092_v17 = vadd.f32 %v933_v15, %v891_v13  ;;  %v6100_v21 = vpack.c.bf16 %v6088_v14, %v6094_v18 }
 0x279   :  { %v937_v19 = vpack.c.bf16 %v6092_v17, %v6090_v16 }
 0x27b   :  { %1578 = vmatprep.mubr.bf16.mxu0 %v937_v19  ;;  %1621 = vmatprep.mubr.bf16.mxu1 %v937_v19 }
 0x27c   :  { %1579 = vmatmul.mubr.bf16.vlgmr.msra.gmra.mxu0 %v6100_v21  ;;  %1622 = vmatmul.mubr.bf16.vlgmr.msra.gmra.mxu1 %v6100_v21 }
 0x27d   :  { %1633 = vmatpush1.bf16.msra.mxu0 %v5415_v20  ;;  %1664 = vmatprep.mubr.bf16.mxu0 %v937_v19 }
 0x27e   :  { %1634 = vmatprep.subr.bf16.mxu0 %v5420_v22  ;;  %5067 = vmatprep.mubr.msk.f32.mxu1 %vm5925_vm3, %v5924_v61 }
 0x281   :  { %1635 = vmatpush1.bf16.msra.mxu0 %v5418_v23 }
 0x282   :  { %1636 = vmatprep.subr.bf16.mxu0 %v5423_v24 }
 0x285   :  { %1637 = vmatpush1.bf16.msra.mxu0 %v5421_v25 }
 0x286   :  { %1638 = vmatprep.subr.bf16.mxu0 %v5426_v26 }
 0x289   :  { %1639 = vmatpush1.bf16.msra.mxu0 %v5424_v27  ;;  %v1054_v27 = vsub.s32 4, %v6075_v62 }
 0x28a   :  { %1640 = vmatprep.subr.bf16.mxu0 %v5429_v28 }
 0x28d   :  { %1641 = vmatpush1.bf16.msra.mxu0 %v5427_v29  ;;  %v6166_v29 = vrot.slane %v6111_v57, %v1054_v27 }
 0x28e   :  { %1642 = vmatprep.subr.bf16.mxu0 %v5432_v30 }
 0x291   :  { %1643 = vmatpush1.bf16.msra.mxu0 %v5430_v31 }
 0x292   :  { %1644 = vmatprep.subr.bf16.mxu0 %v5435_v32 }
 0x295   :  { %1645 = vmatpush1.bf16.msra.mxu0 %v5433_v33 }
 0x296   :  { %1646 = vmatprep.subr.bf16.mxu0 %v5438_v34 }
 0x299   :  { %1647 = vmatpush1.bf16.msra.mxu0 %v5436_v35 }
 0x29a   :  { %1648 = vmatprep.subr.bf16.mxu0 %v5441_v36 }
 0x29d   :  { %1649 = vmatpush2.bf16.msra.mxu0 %v5439_v40 }
 0x29e   :  { %1650 = vmatprep.subr.bf16.mxu0 %v5444_v41 }
 0x2a1   :  { %1651 = vmatpush2.bf16.msra.mxu0 %v5442_v42 }
 0x2a2   :  { %1652 = vmatprep.subr.bf16.mxu0 %v5447_v43 }
 0x2a5   :  { %1653 = vmatpush2.bf16.msra.mxu0 %v5445_v45 }
 0x2a6   :  { %1654 = vmatprep.subr.bf16.mxu0 %v5450_v46 }
 0x2a9   :  { %1655 = vmatpush2.bf16.msra.mxu0 %v5448_v47 }
 0x2aa   :  { %1656 = vmatprep.subr.bf16.mxu0 %v5453_v48 }
 0x2ad   :  { %1657 = vmatpush2.bf16.msra.mxu0 %v5451_v49 }
 0x2ae   :  { %1658 = vmatprep.subr.bf16.mxu0 %v5456_v50 }
 0x2b1   :  { %1659 = vmatpush2.bf16.msra.mxu0 %v5454_v51 }
 0x2b2   :  { %1660 = vmatprep.subr.bf16.mxu0 %v5459_v52 }
 0x2b5   :  { %1661 = vmatpush2.bf16.msra.mxu0 %v5457_v53 }
 0x2b6   :  { %1662 = vmatprep.subr.bf16.mxu0 %v5462_v54 }
 0x2b9   :  { %1663 = vmatpush2.bf16.msra.mxu0 %v5460_v55 }
 0x2bc   :  { %1665 = vmatmul.mubr.bf16.vlgmr.msra.gmra.mxu0 %v6100_v21 }
 0x33c   :  { %v1623_v2 = vpop.f32.mrf.mxu1  ;;  %v1580_v3 = vpop.f32.mrf.mxu0 }
 0x33d   :  { %v1624_v4 = vadd.f32 %v1623_v2, %v1047_v59  ;;  %v1581_v7 = vadd.f32 %v1580_v3, %v1039_v1 }
 0x33e   :  { %v1625_v5 = vpop.f32.mrf.mxu1  ;;  %v1582_v9 = vpop.f32.mrf.mxu0 }
 0x33f   :  { %v1626_v6 = vadd.f32 %v1625_v5, %v1051_v60  ;;  %1689 = vrot.lane.b32.xlu1 %v1624_v4, %s5920_s24  ;;  %5066 = vmatpush3.xpose.msk.msra.mxu1 %vm1715_vm4, %v1624_v4  ;;  %v1583_v12 = vadd.f32 %v1582_v9, %v1043_v8 }
 0x340   :  { %v1627_v37 = vpop.f32.mrf.mxu1  ;;  %5070 = vmatprep.subr.mxu1 %v5924_v61  ;;  %v1584_v13 = vpop.f32.mrf.mxu0 }
 0x341   :  { %1695 = vrot.lane.b32.xlu0 %v1626_v6, %s5920_s24  ;;  %v1628_v10 = vadd.f32 %v1627_v37, %v1047_v59  ;;  %v1585_v19 = vadd.f32 %v1584_v13, %v1039_v1 }
 0x342   :  { %5068 = vmatmul.mubr.msk.f32.vlgmr.msra.gmra.mxu1 %vm1715_vm4, %v1581_v7  ;;  %v1629_v11 = vpop.f32.mrf.mxu1  ;;  %v1586_v20 = vpop.f32.mrf.mxu0 }
 0x343   :  { %1677 = vrot.lane.b32.xlu1 %v1581_v7, %s5920_s24  ;;  %5072 = vmatprep.mubr.msk.f32.mxu1 %vm5925_vm3, %v5924_v61  ;;  %v1630_v15 = vadd.f32 %v1629_v11, %v1051_v60  ;;  %v1587_v21 = vadd.f32 %v1586_v20, %v1043_v8 }
 0x345   :  { %1691 = vrot.lane.b32.xlu0 %v1628_v10, %s5920_s24 }
 0x347   :  { %1683 = vrot.lane.b32.xlu1 %v1583_v12, %s5920_s24 }
 0x349   :  { %1697 = vrot.lane.b32.xlu0 %v1630_v15, %s5920_s24 }
 0x34b   :  { %1679 = vrot.lane.b32.xlu1 %v1585_v19, %s5920_s24 }
 0x34f   :  { %1685 = vrot.lane.b32.xlu1 %v1587_v21, %s5920_s24 }
 0x37c   :  { %v1666_v30 = vpop.f32.mrf.mxu0 }
 0x37d   :  { %v1667_v32 = vadd.f32 %v1666_v30, %v6166_v29 }
 0x3b1   :  { %v1690_v22 = vpop.permute.xlu1 %1689 }
 0x3b2   :  { %5071 = vmatpush3.xpose.msk.msra.mxu1 %vm1715_vm4, %v1690_v22 }
 0x3b3   :  { %5075 = vmatprep.subr.mxu1 %v5924_v61  ;;  %v1696_v24 = vpop.permute.xlu0 %1695 }
 0x3b5   :  { %v1678_v23 = vpop.permute.xlu1 %1677 }
 0x3b6   :  { %5073 = vmatmul.mubr.msk.f32.vlgmr.msra.gmra.mxu1 %vm1715_vm4, %v1678_v23 }
 0x3b7   :  { %5076 = vmatpush3.xpose.msk.msra.mxu1 %vm1715_vm4, %v1626_v6  ;;  %5077 = vmatprep.mubr.msk.f32.mxu1 %vm5925_vm3, %v5924_v61  ;;  %v1692_v26 = vpop.permute.xlu0 %1691 }
 0x3b8   :  { %5080 = vmatprep.subr.mxu1 %v5924_v61 }
 0x3b9   :  { %v1684_v25 = vpop.permute.xlu1 %1683 }
 0x3ba   :  { %5078 = vmatmul.mubr.msk.f32.vlgmr.msra.gmra.mxu1 %vm1715_vm4, %v1583_v12 }
 0x3bb   :  { %5081 = vmatpush3.xpose.msk.msra.mxu1 %vm1715_vm4, %v1696_v24  ;;  %5082 = vmatprep.mubr.msk.f32.mxu1 %vm5925_vm3, %v5924_v61  ;;  %v1698_v31 = vpop.permute.xlu0 %1697 }
 0x3bc   :  { %5085 = vmatprep.subr.mxu1 %v5924_v61 }
 0x3bd   :  { %v1680_v28 = vpop.permute.xlu1 %1679 }
 0x3be   :  { %5083 = vmatmul.mubr.msk.f32.vlgmr.msra.gmra.mxu1 %vm1715_vm4, %v1684_v25 }
 0x3bf   :  { %5086 = vmatpush3.xpose.msk.msra.mxu1 %vm1715_vm4, %v1628_v10  ;;  %5087 = vmatprep.mubr.msk.f32.mxu1 %vm5925_vm3, %v5924_v61 }
 0x3c0   :  { %5090 = vmatprep.subr.mxu1 %v5924_v61 }
 0x3c1   :  { %v1686_v33 = vpop.permute.xlu1 %1685 }
 0x3c2   :  { %5088 = vmatmul.mubr.msk.f32.vlgmr.msra.gmra.mxu1 %vm1715_vm4, %v1585_v19 }
 0x3c3   :  { %5091 = vmatpush3.xpose.msk.msra.mxu1 %vm1715_vm4, %v1692_v26  ;;  %5092 = vmatprep.mubr.msk.f32.mxu1 %vm5925_vm3, %v5924_v61 }
 0x3c4   :  { %5095 = vmatprep.subr.mxu1 %v5924_v61 }
 0x3c6   :  { %5093 = vmatmul.mubr.msk.f32.vlgmr.msra.gmra.mxu1 %vm1715_vm4, %v1680_v28 }
 0x3c7   :  { %5096 = vmatpush3.xpose.msk.msra.mxu1 %vm1715_vm4, %v1630_v15  ;;  %5097 = vmatprep.mubr.msk.f32.mxu1 %vm5925_vm3, %v5924_v61 }
 0x3c8   :  { %5100 = vmatprep.subr.mxu1 %v5924_v61 }
 0x3ca   :  { %5098 = vmatmul.mubr.msk.f32.vlgmr.msra.gmra.mxu1 %vm1715_vm4, %v1587_v21 }
 0x3cb   :  { %5101 = vmatpush3.xpose.msk.msra.mxu1 %vm1715_vm4, %v1698_v31  ;;  %5102 = vmatprep.mubr.msk.f32.mxu1 %vm5925_vm3, %v5924_v61 }
 0x3cc   :  { %5105 = vmatprep.subr.mxu1 %v5924_v61 }
 0x3ce   :  { %5103 = vmatmul.mubr.msk.f32.vlgmr.msra.gmra.mxu1 %vm1715_vm4, %v1686_v33 }
 0x3cf   :  { %5106 = vmatpush3.msra.mxu1 %v1667_v32  ;;  %5107 = vmatprep.mubr.msk.f32.mxu1 %vm5925_vm3, %v5924_v61 }
 0x3d0   :  { %5110 = vmatprep.subr.mxu1 %v5924_v61 }
 0x402   :  { %v1786_v34 = vpop.f32.mrf.mxu1 }
 0x403   :  { %v2308_v35 = vmul.f32 0.125, %v1786_v34 }
 0x404   :  { %v5069_v36 = vpop.f32.mrf.mxu1 }
 0x405   :  { %v2317_v40 = vsel %vm2316_vm5, %v2308_v35, -inf }
 0x406   :  { %2318 = vmax.xlane.f32.xlu0 %v2317_v40 }
 0x476   :  { %v1860_v41 = vpop.f32.mrf.mxu1 }
 0x477   :  { %v2309_v42 = vmul.f32 0.125, %v1860_v41 }
 0x478   :  { %v5074_v43 = vpop.f32.mrf.mxu1 }
 0x479   :  { %v2320_v45 = vsel %vm2316_vm5, %v2309_v42, -inf }
 0x47a   :  { %2321 = vmax.xlane.f32.xlu1 %v2320_v45  ;;  %v1934_v46 = vpop.f32.mrf.mxu1 }
 0x47b   :  { %v2310_v47 = vmul.f32 0.125, %v1934_v46 }
 0x47c   :  { %v5079_v48 = vpop.f32.mrf.mxu1 }
 0x47d   :  { %v2323_v49 = vsel %vm2316_vm5, %v2310_v47, -inf }
 0x47e   :  { %2324 = vmax.xlane.f32.xlu0 %v2323_v49  ;;  %v2008_v50 = vpop.f32.mrf.mxu1 }
 0x47f   :  { %v2311_v51 = vmul.f32 0.125, %v2008_v50 }
 0x480   :  { %v5084_v52 = vpop.f32.mrf.mxu1 }
 0x481   :  { %v2326_v53 = vsel %vm2316_vm5, %v2311_v51, -inf }
 0x482   :  { %2327 = vmax.xlane.f32.xlu0 %v2326_v53  ;;  %v2082_v54 = vpop.f32.mrf.mxu1 }
 0x483   :  { %v2312_v55 = vmul.f32 0.125, %v2082_v54 }
 0x484   :  { %v5089_v59 = vpop.f32.mrf.mxu1 }
 0x485   :  { %v2329_v60 = vsel %vm2316_vm5, %v2312_v55, -inf }
 0x486   :  { %2330 = vmax.xlane.f32.xlu1 %v2329_v60  ;;  %v2156_v1 = vpop.f32.mrf.mxu1 }
 0x487   :  { %v2313_v2 = vmul.f32 0.125, %v2156_v1 }
 0x488   :  { %v5094_v3 = vpop.f32.mrf.mxu1 }
 0x489   :  { %v2332_v4 = vsel %vm2316_vm5, %v2313_v2, -inf }
 0x48a   :  { %2333 = vmax.xlane.f32.xlu0 %v2332_v4  ;;  %v2230_v5 = vpop.f32.mrf.mxu1  ;;  %v1668_v4 = vpop.f32.mrf.mxu0 }
 0x48b   :  { %v2314_v6 = vmul.f32 0.125, %v2230_v5 }
 0x48c   :  { %v5099_v7 = vpop.f32.mrf.mxu1  ;;  %v1670_v5 = vpop.f32.mrf.mxu0 }
 0x48d   :  { %v2335_v37 = vsel %vm2316_vm5, %v2314_v6, -inf  ;;  %v1671_v7 = vadd.f32 %v1670_v5, %v6166_v29  ;;  %v5486_v5 = vld [vmem:[#allocation7 + $0x4] ss:$8 sps:$4 sm:$0xff]  }
 0x48e   :  { %2336 = vmax.xlane.f32.xlu1 %v2335_v37  ;;  %v2304_v8 = vpop.f32.mrf.mxu1  ;;  %v1672_v37 = vpop.f32.mrf.mxu0 }
 0x48f   :  { %v2315_v9 = vmul.f32 0.125, %v2304_v8  ;;  %v2319_v12 = vpop.xlane.xlu0 %2318 }
 0x490   :  { %v5104_v10 = vpop.f32.mrf.mxu1  ;;  %v2341_v13 = vsub.f32 %v2308_v35, %v2319_v12 }
 0x491   :  { %v2338_v11 = vsel %vm2316_vm5, %v2315_v9, -inf }
 0x492   :  { %2339 = vmax.xlane.f32.xlu0 %v2338_v11  ;;  %v2349_v15 = vmul.f32 1.442695, %v2341_v13 }
 0x494   :  { %5719 = vpow2.f32 %v2349_v15 }
 0x49f   :  { %1701 = vrot.lane.b32.xlu1 %v1667_v32, %s5920_s24 }
 0x4a1   :  { %v6187_v19 = vpop.eup %5719 }
 0x4a2   :  { %v2365_v20 = vsel %vm2316_vm5, %v6187_v19, 0.0 }
 0x4c3   :  { %2366 = vadd.xlane.f32.xlu1 %v2365_v20 }
 0x503   :  { %v2322_v21 = vpop.xlane.xlu1 %2321 }
 0x504   :  { %v2342_v22 = vsub.f32 %v2309_v42, %v2322_v21 }
 0x506   :  { %v2351_v23 = vmul.f32 1.442695, %v2342_v22 }
 0x507   :  { %v2325_v24 = vpop.xlane.xlu0 %2324 }
 0x508   :  { %5721 = vpow2.f32 %v2351_v23  ;;  %v2343_v25 = vsub.f32 %v2310_v47, %v2325_v24 }
 0x50a   :  { %v2353_v26 = vmul.f32 1.442695, %v2343_v25 }
 0x50b   :  { %v2328_v27 = vpop.xlane.xlu0 %2327 }
 0x50c   :  { %5723 = vpow2.f32 %v2353_v26  ;;  %v2344_v28 = vsub.f32 %v2311_v51, %v2328_v27 }
 0x50e   :  { %v2355_v30 = vmul.f32 1.442695, %v2344_v28 }
 0x50f   :  { %v2331_v31 = vpop.xlane.xlu1 %2330 }
 0x510   :  { %5725 = vpow2.f32 %v2355_v30  ;;  %v2345_v32 = vsub.f32 %v2312_v55, %v2331_v31 }
 0x512   :  { %v2357_v33 = vmul.f32 1.442695, %v2345_v32 }
 0x513   :  { %v2334_v34 = vpop.xlane.xlu0 %2333 }
 0x514   :  { %5727 = vpow2.f32 %v2357_v33  ;;  %v2346_v35 = vsub.f32 %v2313_v2, %v2334_v34 }
 0x515   :  { %v5722_v36 = vpop.eup %5721 }
 0x516   :  { %v2359_v40 = vmul.f32 1.442695, %v2346_v35  ;;  %v2368_v41 = vsel %vm2316_vm5, %v5722_v36, 0.0 }
 0x517   :  { %v2337_v42 = vpop.xlane.xlu1 %2336  ;;  %2369 = vadd.xlane.f32.xlu0 %v2368_v41 }
 0x518   :  { %5729 = vpow2.f32 %v2359_v40  ;;  %v2347_v43 = vsub.f32 %v2314_v6, %v2337_v42  ;;  %v1058_v6 = vsub.s32 5, %v6075_v62 }
 0x519   :  { %v5724_v45 = vpop.eup %5723 }
 0x51a   :  { %v2361_v46 = vmul.f32 1.442695, %v2347_v43  ;;  %v2371_v47 = vsel %vm2316_vm5, %v5724_v45, 0.0  ;;  %v1059_v8 = vrot.slane %v6111_v57, %v1058_v6  ;;  %v5484_v6 = vld [vmem:[#allocation7] ss:$8 sps:$4 sm:$0xff]  }
 0x51b   :  { %2372 = vadd.xlane.f32.xlu1 %v2371_v47  ;;  %v2340_v48 = vpop.xlane.xlu0 %2339  ;;  %v1702_v11 = vpop.permute.xlu1 %1701  ;;  %v5465_v47 = vld [vmem:[#allocation7 + $0x74] ss:$8 sps:$4 sm:$0xff]  }
 0x51c   :  { %5731 = vpow2.f32 %v2361_v46  ;;  %v2348_v49 = vsub.f32 %v2315_v9, %v2340_v48  ;;  %v1673_v9 = vadd.f32 %v1672_v37, %v1059_v8  ;;  %v1669_v10 = vadd.f32 %v1668_v4, %v1059_v8  ;;  %v5463_v46 = vld [vmem:[#allocation7 + $0x70] ss:$8 sps:$4 sm:$0xff]   ;;  %v5468_v48 = vld [vmem:[#allocation7 + $0x64] ss:$8 sps:$4 sm:$0xff]   ;;  %3215 = vmatprep.subr.bf16.mxu0 %v5465_v47 }
 0x51d   :  { %v6193_v50 = vpop.eup %5725  ;;  %3216 = vmatpush1.bf16.msra.mxu0 %v5463_v46  ;;  %v5481_v4 = vld [vmem:[#allocation7 + $0x10] ss:$8 sps:$4 sm:$0xff]   ;;  %v5492_v8 = vld [vmem:[#allocation7 + $0xe4] ss:$8 sps:$4 sm:$0xff]  }
 0x51e   :  { %v2363_v51 = vmul.f32 1.442695, %v2348_v49  ;;  %v2374_v52 = vsel %vm2316_vm5, %v6193_v50, 0.0  ;;  %v5466_v49 = vld [vmem:[#allocation7 + $0x60] ss:$8 sps:$4 sm:$0xff]   ;;  %3217 = vmatprep.subr.bf16.mxu0 %v5468_v48 }
 0x51f   :  { %2375 = vadd.xlane.f32.xlu0 %v2374_v52  ;;  %v5474_v52 = vld [vmem:[#allocation7 + $0x44] ss:$8 sps:$4 sm:$0xff]   ;;  %v5487_v37 = vld [vmem:[#allocation7 + $0xf0] ss:$8 sps:$4 sm:$0xff]  }
 0x520   :  { %5733 = vpow2.f32 %v2363_v51  ;;  %v5469_v51 = vld [vmem:[#allocation7 + $0x50] ss:$8 sps:$4 sm:$0xff]  }
 0x521   :  { %v6197_v53 = vpop.eup %5727  ;;  %3218 = vmatpush1.bf16.msra.mxu0 %v5466_v49 }
 0x522   :  { %v2377_v54 = vsel %vm2316_vm5, %v6197_v53, 0.0 }
 0x523   :  { %2378 = vadd.xlane.f32.xlu1 %v2377_v54 }
 0x525   :  { %v6201_v55 = vpop.eup %5729 }
 0x526   :  { %v2380_v59 = vsel %vm2316_vm5, %v6201_v55, 0.0 }
 0x527   :  { %2381 = vadd.xlane.f32.xlu0 %v2380_v59 }
 0x529   :  { %v6205_v60 = vpop.eup %5731 }
 0x52a   :  { %v2383_v1 = vsel %vm2316_vm5, %v6205_v60, 0.0 }
 0x52b   :  { %2384 = vadd.xlane.f32.xlu1 %v2383_v1  ;;  %v5480_v1 = vld [vmem:[#allocation7 + $0x24] ss:$8 sps:$4 sm:$0xff]  }
 0x52d   :  { %v6209_v2 = vpop.eup %5733 }
 0x52e   :  { %v2386_v3 = vsel %vm2316_vm5, %v6209_v2, 0.0 }
 0x52f   :  { %2387 = vadd.xlane.f32.xlu0 %v2386_v3  ;;  %v5483_v3 = vld [vmem:[#allocation7 + $0x14] ss:$8 sps:$4 sm:$0xff]  }
 0x53c   :  { %1703 = vrot.lane.b32.xlu1 %v1671_v7, %s5920_s24 }
 0x540   :  { %1711 = vrot.lane.b32.xlu1 %v1673_v9, %s5920_s24 }
 0x545   :  { %1709 = vrot.lane.b32.xlu0 %v1669_v10, %s5920_s24 }
 0x54c   :  { %v2367_v12 = vpop.xlane.xlu1 %2366 }
 0x54d   :  { %5735 = vrcp.f32 %v2367_v12  ;;  %v5498_v12 = vld [vmem:[#allocation7 + $0xc4] ss:$8 sps:$4 sm:$0xff]  }
 0x55a   :  { %v5736_v13 = vpop.eup %5735 }
 0x55b   :  { %v2390_v15 = vmul.f32 %v5736_v13, %v6187_v19  ;;  %v5496_v13 = vld [vmem:[#allocation7 + $0xc0] ss:$8 sps:$4 sm:$0xff]  }
 0x55d   :  { %5108 = vmatmul.mubr.msk.f32.vlgmr.msra.gmra.mxu1 %vm2316_vm5, %v2390_v15  ;;  %v5501_v15 = vld [vmem:[#allocation7 + $0xb4] ss:$8 sps:$4 sm:$0xff]  }
 0x55e   :  { %5111 = vmatpush3.msra.mxu1 %v1702_v11  ;;  %5112 = vmatprep.mubr.msk.f32.mxu1 %vm5925_vm3, %v5924_v61  ;;  %v5493_v11 = vld [vmem:[#allocation7 + $0xd0] ss:$8 sps:$4 sm:$0xff]  }
 0x55f   :  { %5115 = vmatprep.subr.mxu1 %v5924_v61 }
 0x5a0   :  { %v2370_v57 = vpop.xlane.xlu0 %2369 }
 0x5a1   :  { %5737 = vrcp.f32 %v2370_v57  ;;  %v5499_v57 = vld [vmem:[#allocation7 + $0xb0] ss:$8 sps:$4 sm:$0xff]  }
 0x5a4   :  { %v2373_v29 = vpop.xlane.xlu1 %2372 }
 0x5a5   :  { %5739 = vrcp.f32 %v2373_v29 }
 0x5a8   :  { %v2376_v20 = vpop.xlane.xlu0 %2375 }
 0x5a9   :  { %5741 = vrcp.f32 %v2376_v20 }
 0x5ac   :  { %v2379_v21 = vpop.xlane.xlu1 %2378 }
 0x5ad   :  { %5743 = vrcp.f32 %v2379_v21 }
 0x5ae   :  { %v5738_v22 = vpop.eup %5737 }
 0x5af   :  { %v2392_v23 = vmul.f32 %v5738_v22, %v5722_v36 }
 0x5b0   :  { %v2382_v24 = vpop.xlane.xlu0 %2381 }
 0x5b1   :  { %5113 = vmatmul.mubr.msk.f32.vlgmr.msra.gmra.mxu1 %vm2316_vm5, %v2392_v23  ;;  %5745 = vrcp.f32 %v2382_v24  ;;  %v5504_v23 = vld [vmem:[#allocation7 + $0xa4] ss:$8 sps:$4 sm:$0xff]  }
 0x5b2   :  { %v5740_v19 = vpop.eup %5739  ;;  %5116 = vmatpush3.msra.mxu1 %v1669_v10  ;;  %5117 = vmatprep.mubr.msk.f32.mxu1 %vm5925_vm3, %v5924_v61  ;;  %v5495_v10 = vld [vmem:[#allocation7 + $0xd4] ss:$8 sps:$4 sm:$0xff]  }
 0x5b3   :  { %v2394_v25 = vmul.f32 %v5740_v19, %v5724_v45  ;;  %5120 = vmatprep.subr.mxu1 %v5924_v61  ;;  %v5502_v19 = vld [vmem:[#allocation7 + $0xa0] ss:$8 sps:$4 sm:$0xff]  }
 0x5b4   :  { %v2385_v26 = vpop.xlane.xlu1 %2384 }
 0x5b5   :  { %5118 = vmatmul.mubr.msk.f32.vlgmr.msra.gmra.mxu1 %vm2316_vm5, %v2394_v25  ;;  %5747 = vrcp.f32 %v2385_v26  ;;  %v5507_v25 = vld [vmem:[#allocation7 + $0x94] ss:$8 sps:$4 sm:$0xff]  }
 0x5b6   :  { %5122 = vmatprep.mubr.msk.f32.mxu1 %vm5925_vm3, %v5924_v61  ;;  %v5742_v28 = vpop.eup %5741 }
 0x5b7   :  { %v2396_v31 = vmul.f32 %v5742_v28, %v6193_v50  ;;  %v5471_v50 = vld [vmem:[#allocation7 + $0x54] ss:$8 sps:$4 sm:$0xff]  }
 0x5b8   :  { %v2388_v27 = vpop.xlane.xlu0 %2387  ;;  %v1704_v35 = vpop.permute.xlu1 %1703  ;;  %3219 = vmatprep.subr.bf16.mxu0 %v5471_v50 }
 0x5b9   :  { %5749 = vrcp.f32 %v2388_v27  ;;  %3220 = vmatpush1.bf16.msra.mxu0 %v5469_v51  ;;  %v5505_v27 = vld [vmem:[#allocation7 + $0x90] ss:$8 sps:$4 sm:$0xff]  }
 0x5ba   :  { %v5744_v32 = vpop.eup %5743  ;;  %3221 = vmatprep.subr.bf16.mxu0 %v5474_v52 }
 0x5bb   :  { %v2398_v33 = vmul.f32 %v5744_v32, %v6197_v53  ;;  %v5472_v53 = vld [vmem:[#allocation7 + $0x40] ss:$8 sps:$4 sm:$0xff]   ;;  %v5510_v32 = vld [vmem:[#allocation7 + $0x84] ss:$8 sps:$4 sm:$0xff]  }
 0x5bc   :  { %v1710_v30 = vpop.permute.xlu0 %1709  ;;  %v1712_v43 = vpop.permute.xlu1 %1711 }
 0x5bd   :  { %5121 = vmatpush3.msra.mxu1 %v1710_v30  ;;  %3222 = vmatpush1.bf16.msra.mxu0 %v5472_v53 }
 0x5be   :  { %5123 = vmatmul.mubr.msk.f32.vlgmr.msra.gmra.mxu1 %vm2316_vm5, %v2396_v31  ;;  %5125 = vmatprep.subr.mxu1 %v5924_v61  ;;  %v5746_v34 = vpop.eup %5745  ;;  %v5508_v31 = vld [vmem:[#allocation7 + $0x80] ss:$8 sps:$4 sm:$0xff]  }
 0x5bf   :  { %5126 = vmatpush3.msra.mxu1 %v1671_v7  ;;  %5127 = vmatprep.mubr.msk.f32.mxu1 %vm5925_vm3, %v5924_v61  ;;  %v2400_v36 = vmul.f32 %v5746_v34, %v6201_v55  ;;  %v5477_v55 = vld [vmem:[#allocation7 + $0x34] ss:$8 sps:$4 sm:$0xff]  }
 0x5c0   :  { %5130 = vmatprep.subr.mxu1 %v5924_v61  ;;  %3223 = vmatprep.subr.bf16.mxu0 %v5477_v55  ;;  %v5489_v7 = vld [vmem:[#allocation7 + $0xf4] ss:$8 sps:$4 sm:$0xff]  }
 0x5c2   :  { %5128 = vmatmul.mubr.msk.f32.vlgmr.msra.gmra.mxu1 %vm2316_vm5, %v2398_v33  ;;  %v5748_v40 = vpop.eup %5747 }
 0x5c3   :  { %5131 = vmatpush3.msra.mxu1 %v1704_v35  ;;  %5132 = vmatprep.mubr.msk.f32.mxu1 %vm5925_vm3, %v5924_v61  ;;  %v2402_v41 = vmul.f32 %v5748_v40, %v6205_v60  ;;  %v5475_v60 = vld [vmem:[#allocation7 + $0x30] ss:$8 sps:$4 sm:$0xff]  }
 0x5c4   :  { %5135 = vmatprep.subr.mxu1 %v5924_v61  ;;  %3224 = vmatpush1.bf16.msra.mxu0 %v5475_v60 }
 0x5c5   :  { %3225 = vmatprep.subr.bf16.mxu0 %v5480_v1  ;;  %v3043_v1 = vld [vmem:[%s6383_s7] sm:$0x3] }
 0x5c6   :  { %5133 = vmatmul.mubr.msk.f32.vlgmr.msra.gmra.mxu1 %vm2316_vm5, %v2400_v36  ;;  %v5750_v42 = vpop.eup %5749 }
 0x5c7   :  { %5136 = vmatpush3.msra.mxu1 %v1673_v9  ;;  %5137 = vmatprep.mubr.msk.f32.mxu1 %vm5925_vm3, %v5924_v61  ;;  %v2404_v45 = vmul.f32 %v5750_v42, %v6209_v2  ;;  %v5478_v2 = vld [vmem:[#allocation7 + $0x20] ss:$8 sps:$4 sm:$0xff]  }
 0x5c8   :  { %5140 = vmatprep.subr.mxu1 %v5924_v61  ;;  %3226 = vmatpush1.bf16.msra.mxu0 %v5478_v2  ;;  %v5490_v9 = vld [vmem:[#allocation7 + $0xe0] ss:$8 sps:$4 sm:$0xff]   ;;  %v3048_v2 = vrot.slane %v3043_v1, %v6081_v0 }
 0x5c9   :  { %3227 = vmatprep.subr.bf16.mxu0 %v5483_v3  ;;  %v3052_v3 = vrot.slane %v3043_v1, %v6078_v63 }
 0x5ca   :  { %5138 = vmatmul.mubr.msk.f32.vlgmr.msra.gmra.mxu1 %vm2316_vm5, %v2402_v41 }
 0x5cb   :  { %5141 = vmatpush3.msra.mxu1 %v1712_v43  ;;  %5142 = vmatprep.mubr.msk.f32.mxu1 %vm5925_vm3, %v5924_v61 }
 0x5cc   :  { %3228 = vmatpush1.bf16.msra.mxu0 %v5481_v4 }
 0x5cd   :  { %3229 = vmatprep.subr.bf16.mxu0 %v5486_v5 }
 0x5ce   :  { %5143 = vmatmul.mubr.msk.f32.vlgmr.msra.gmra.mxu1 %vm2316_vm5, %v2404_v45 }
 0x5d0   :  { %3230 = vmatpush1.bf16.msra.mxu0 %v5484_v6 }
 0x5d1   :  { %3231 = vmatprep.subr.bf16.mxu0 %v5489_v7 }
 0x5d4   :  { %3232 = vmatpush2.bf16.msra.mxu0 %v5487_v37 }
 0x5d5   :  { %3233 = vmatprep.subr.bf16.mxu0 %v5492_v8 }
 0x5d8   :  { %3234 = vmatpush2.bf16.msra.mxu0 %v5490_v9 }
 0x5d9   :  { %3235 = vmatprep.subr.bf16.mxu0 %v5495_v10 }
 0x5dc   :  { %3236 = vmatpush2.bf16.msra.mxu0 %v5493_v11 }
 0x5dd   :  { %3237 = vmatprep.subr.bf16.mxu0 %v5498_v12 }
 0x5e0   :  { %3238 = vmatpush2.bf16.msra.mxu0 %v5496_v13 }
 0x5e1   :  { %3239 = vmatprep.subr.bf16.mxu0 %v5501_v15 }
 0x5e4   :  { %3240 = vmatpush2.bf16.msra.mxu0 %v5499_v57  ;;  %v5511_v57 = vld [vmem:[#allocation9 + $0xe0] ss:$16 sps:$4 sm:$0xff]  }
 0x5e5   :  { %3241 = vmatprep.subr.bf16.mxu0 %v5504_v23  ;;  %v5517_v23 = vld [vmem:[#allocation9 + $0xc0] ss:$16 sps:$4 sm:$0xff]  }
 0x5e8   :  { %3242 = vmatpush2.bf16.msra.mxu0 %v5502_v19  ;;  %v5523_v19 = vld [vmem:[#allocation9 + $0xa0] ss:$16 sps:$4 sm:$0xff]  }
 0x5e9   :  { %3243 = vmatprep.subr.bf16.mxu0 %v5507_v25  ;;  %v5526_v25 = vld [vmem:[#allocation9 + $0xa8] ss:$16 sps:$4 sm:$0xff]  }
 0x5ec   :  { %3244 = vmatpush2.bf16.msra.mxu0 %v5505_v27  ;;  %v5534_v27 = vld [vmem:[#allocation9 + $0x8c] ss:$16 sps:$4 sm:$0xff]  }
 0x5ed   :  { %3245 = vmatprep.subr.bf16.mxu0 %v5510_v32  ;;  %v5540_v32 = vld [vmem:[#allocation9 + $0x6c] ss:$16 sps:$4 sm:$0xff]  }
 0x5f0   :  { %3246 = vmatpush2.bf16.msra.mxu0 %v5508_v31  ;;  %v5537_v31 = vld [vmem:[#allocation9 + $0x64] ss:$16 sps:$4 sm:$0xff]  }
 0x61d   :  { %v6253_v54 = vpop.f32.mrf.mxu1 }
 0x61f   :  { %v5109_v59 = vpop.f32.mrf.mxu1 }
 0x671   :  { %v2547_v29 = vpop.f32.mrf.mxu1 }
 0x673   :  { %v5114_v20 = vpop.f32.mrf.mxu1 }
 0x674   :  { %v5516_v20 = vld [vmem:[#allocation9 + $0xec] ss:$16 sps:$4 sm:$0xff]  }
 0x675   :  { %v2620_v21 = vpop.f32.mrf.mxu1  ;;  %3778 = vmatprep.subr.bf16.mxu0 %v5516_v20  ;;  %v5579_v20 = vld [vmem:[#allocation9 + $0x184] ss:$16 sps:$4 sm:$0xff]  }
 0x677   :  { %v5119_v22 = vpop.f32.mrf.mxu1 }
 0x678   :  { %v5522_v22 = vld [vmem:[#allocation9 + $0xcc] ss:$16 sps:$4 sm:$0xff]  }
 0x67e   :  { %v2693_v24 = vpop.f32.mrf.mxu1 }
 0x680   :  { %v5124_v26 = vpop.f32.mrf.mxu1 }
 0x681   :  { %v5531_v26 = vld [vmem:[#allocation9 + $0x84] ss:$16 sps:$4 sm:$0xff]  }
 0x682   :  { %v2766_v28 = vpop.f32.mrf.mxu1 }
 0x684   :  { %v5129_v30 = vpop.f32.mrf.mxu1 }
 0x685   :  { %v5532_v30 = vld [vmem:[#allocation9 + $0x88] ss:$16 sps:$4 sm:$0xff]  }
 0x686   :  { %v2839_v33 = vpop.f32.mrf.mxu1 }
 0x687   :  { %v5170_v34 = vpack.i.bf16 %v2839_v33, %v2547_v29  ;;  %v5514_v29 = vld [vmem:[#allocation9 + $0xe8] ss:$16 sps:$4 sm:$0xff]   ;;  %v5535_v33 = vld [vmem:[#allocation9 + $0x60] ss:$16 sps:$4 sm:$0xff]  }
 0x688   :  { %v5134_v35 = vpop.f32.mrf.mxu1 }
 0x689   :  { %5171 = vrot.lane.b32.xlu1 %v5170_v34, %s5920_s24  ;;  %v5538_v34 = vld [vmem:[#allocation9 + $0x68] ss:$16 sps:$4 sm:$0xff]   ;;  %v5543_v35 = vld [vmem:[#allocation9 + $0x44] ss:$16 sps:$4 sm:$0xff]  }
 0x68a   :  { %v2912_v36 = vpop.f32.mrf.mxu1 }
 0x68c   :  { %v5139_v40 = vpop.f32.mrf.mxu1 }
 0x68d   :  { %v5541_v40 = vld [vmem:[#allocation9 + $0x40] ss:$16 sps:$4 sm:$0xff]  }
 0x68e   :  { %v2985_v41 = vpop.f32.mrf.mxu1 }
 0x68f   :  { %v5165_v42 = vpack.i.bf16 %v2985_v41, %v2693_v24  ;;  %v5528_v24 = vld [vmem:[#allocation9 + $0xac] ss:$16 sps:$4 sm:$0xff]   ;;  %v5544_v41 = vld [vmem:[#allocation9 + $0x48] ss:$16 sps:$4 sm:$0xff]  }
 0x690   :  { %v5144_v43 = vpop.f32.mrf.mxu1 }
 0x691   :  { %5166 = vrot.lane.b32.xlu0 %v5165_v42, %s5920_s24  ;;  %v5549_v42 = vld [vmem:[#allocation9 + $0x24] ss:$16 sps:$4 sm:$0xff]   ;;  %v5552_v43 = vld [vmem:[#allocation9 + $0x2c] ss:$16 sps:$4 sm:$0xff]  }
 0x6fb   :  { %v5172_v45 = vpop.permute.xlu1 %5171 }
 0x6fc   :  { %v5174_v46 = vunpack.i.h.bf16 %v5172_v45  ;;  %v5173_v47 = vunpack.i.l.bf16 %v5172_v45  ;;  %v5547_v45 = vld [vmem:[#allocation9 + $0x20] ss:$16 sps:$4 sm:$0xff]  }
 0x6fe   :  { %v3006_v51 = vsel %vm1715_vm4, %v2766_v28, %v5174_v46  ;;  %v3005_v52 = vsel %vm1715_vm4, %v6253_v54, %v5173_v47  ;;  %v5529_v28 = vld [vmem:[#allocation9 + $0x80] ss:$16 sps:$4 sm:$0xff]   ;;  %v5550_v46 = vld [vmem:[#allocation9 + $0x28] ss:$16 sps:$4 sm:$0xff]   ;;  %v5555_v47 = vld [vmem:[#allocation9 + $0x4] ss:$16 sps:$4 sm:$0xff]  }
 0x6ff   :  { %v3009_v60 = vpack.c.bf16 %v3006_v51, %v3005_v52  ;;  %v5561_v51 = vld [vmem:[#allocation9 + $0x1e4] ss:$16 sps:$4 sm:$0xff]   ;;  %v5564_v52 = vld [vmem:[#allocation9 + $0x1ec] ss:$16 sps:$4 sm:$0xff]  }
 0x703   :  { %v5167_v48 = vpop.permute.xlu0 %5166 }
 0x704   :  { %v5169_v49 = vunpack.i.h.bf16 %v5167_v48  ;;  %v5168_v50 = vunpack.i.l.bf16 %v5167_v48  ;;  %v5558_v48 = vld [vmem:[#allocation9 + $0xc] ss:$16 sps:$4 sm:$0xff]  }
 0x706   :  { %v3007_v53 = vsel %vm1715_vm4, %v2620_v21, %v5168_v50  ;;  %v3008_v55 = vsel %vm1715_vm4, %v2912_v36, %v5169_v49  ;;  %v5519_v21 = vld [vmem:[#allocation9 + $0xc4] ss:$16 sps:$4 sm:$0xff]   ;;  %v5546_v36 = vld [vmem:[#allocation9 + $0x4c] ss:$16 sps:$4 sm:$0xff]   ;;  %v5553_v49 = vld [vmem:[#allocation9] ss:$16 sps:$4 sm:$0xff]  }
 0x707   :  { %v3010_v59 = vpack.c.bf16 %v3008_v55, %v3007_v53  ;;  %v5556_v50 = vld [vmem:[#allocation9 + $0x8] ss:$16 sps:$4 sm:$0xff]   ;;  %v5559_v53 = vld [vmem:[#allocation9 + $0x1e0] ss:$16 sps:$4 sm:$0xff]  }
 0x708   :  { %v5562_v55 = vld [vmem:[#allocation9 + $0x1e8] ss:$16 sps:$4 sm:$0xff]  }
 0x709   :  { %3247 = vmatprep.mubr.bf16.mxu0 %v3010_v59 }
 0x70a   :  { %3248 = vmatmul.mubr.bf16.vlgmr.msra.gmra.mxu0 %v3009_v60 }
 0x70b   :  { %3779 = vmatpush1.bf16.msra.mxu0 %v5514_v29  ;;  %v5574_v29 = vld [vmem:[#allocation9 + $0x1a8] ss:$16 sps:$4 sm:$0xff]  }
 0x70c   :  { %3780 = vmatprep.subr.bf16.mxu0 %v5522_v22  ;;  %v5580_v22 = vld [vmem:[#allocation9 + $0x188] ss:$16 sps:$4 sm:$0xff]  }
 0x7ca   :  { %v3249_v4 = vpop.f32.mrf.mxu0 }
 0x7cb   :  { %v3250_v5 = vadd.f32 %v3249_v4, %v3048_v2 }
 0x7cc   :  { %v3251_v6 = vpop.f32.mrf.mxu0 }
 0x7cd   :  { %v3252_v54 = vadd.f32 %v3251_v6, %v3052_v3  ;;  %v6268_v37 = vadd.f32 %v3250_v5, %v6094_v18 }
 0x7ce   :  { %v3253_v7 = vpop.f32.mrf.mxu0 }
 0x7cf   :  { %v6271_v8 = vadd.f32 %v3252_v54, %v6090_v16  ;;  %v3254_v9 = vadd.f32 %v3253_v7, %v3048_v2  ;;  %v5513_v16 = vld [vmem:[#allocation9 + $0xe4] ss:$16 sps:$4 sm:$0xff]  }
 0x7d0   :  { %v3255_v10 = vpop.f32.mrf.mxu0  ;;  %3735 = vmatprep.subr.bf16.mxu1 %v5513_v16  ;;  %v5571_v16 = vld [vmem:[#allocation9 + $0x1a0] ss:$16 sps:$4 sm:$0xff]  }
 0x7d1   :  { %v3256_v11 = vadd.f32 %v3255_v10, %v3052_v3  ;;  %v3264_v12 = vadd.f32 %v6271_v8, %v6268_v37  ;;  %v6276_v13 = vadd.f32 %v3254_v9, %v6088_v14  ;;  %3736 = vmatpush1.bf16.msra.mxu1 %v5511_v57  ;;  %v5520_v14 = vld [vmem:[#allocation9 + $0xc8] ss:$16 sps:$4 sm:$0xff]  }
 0x7d2   :  { %3737 = vmatprep.subr.bf16.mxu1 %v5519_v21  ;;  %3781 = vmatpush1.bf16.msra.mxu0 %v5520_v14  ;;  %v5568_v57 = vld [vmem:[#allocation9 + $0x1c8] ss:$16 sps:$4 sm:$0xff]   ;;  %v5577_v21 = vld [vmem:[#allocation9 + $0x180] ss:$16 sps:$4 sm:$0xff]   ;;  %v5585_v14 = vld [vmem:[#allocation9 + $0x164] ss:$16 sps:$4 sm:$0xff]  }
 0x7d3   :  { %v6279_v15 = vadd.f32 %v3256_v11, %v6092_v17  ;;  %3265 = vadd.xlane.f32.xlu0 %v3264_v12  ;;  %v5525_v17 = vld [vmem:[#allocation9 + $0xa4] ss:$16 sps:$4 sm:$0xff]   ;;  %3782 = vmatprep.subr.bf16.mxu0 %v5528_v24  ;;  %v5570_v12 = vld [vmem:[#allocation9 + $0x1cc] ss:$16 sps:$4 sm:$0xff]   ;;  %v5583_v24 = vld [vmem:[#allocation9 + $0x160] ss:$16 sps:$4 sm:$0xff]  }
 0x7d4   :  { %v5567_v11 = vld [vmem:[#allocation9 + $0x1c4] ss:$16 sps:$4 sm:$0xff]  }
 0x7d5   :  { %v3267_v18 = vadd.f32 %v6279_v15, %v6276_v13  ;;  %3738 = vmatpush1.bf16.msra.mxu1 %v5517_v23  ;;  %v5582_v23 = vld [vmem:[#allocation9 + $0x18c] ss:$16 sps:$4 sm:$0xff]  }
 0x7d6   :  { %3739 = vmatprep.subr.bf16.mxu1 %v5525_v17  ;;  %3783 = vmatpush1.bf16.msra.mxu0 %v5526_v25  ;;  %v5588_v17 = vld [vmem:[#allocation9 + $0x16c] ss:$16 sps:$4 sm:$0xff]   ;;  %v5591_v25 = vld [vmem:[#allocation9 + $0x144] ss:$16 sps:$4 sm:$0xff]  }
 0x7d7   :  { %3268 = vadd.xlane.f32.xlu1 %v3267_v18  ;;  %3784 = vmatprep.subr.bf16.mxu0 %v5534_v27  ;;  %v5565_v18 = vld [vmem:[#allocation9 + $0x1c0] ss:$16 sps:$4 sm:$0xff]  }
 0x7d8   :  { %v5589_v27 = vld [vmem:[#allocation9 + $0x140] ss:$16 sps:$4 sm:$0xff]  }
 0x7d9   :  { %3740 = vmatpush1.bf16.msra.mxu1 %v5523_v19  ;;  %v5586_v19 = vld [vmem:[#allocation9 + $0x168] ss:$16 sps:$4 sm:$0xff]  }
 0x7da   :  { %3741 = vmatprep.subr.bf16.mxu1 %v5531_v26  ;;  %3785 = vmatpush1.bf16.msra.mxu0 %v5532_v30  ;;  %v5594_v26 = vld [vmem:[#allocation9 + $0x14c] ss:$16 sps:$4 sm:$0xff]   ;;  %v5597_v30 = vld [vmem:[#allocation9 + $0x124] ss:$16 sps:$4 sm:$0xff]  }
 0x7db   :  { %3786 = vmatprep.subr.bf16.mxu0 %v5540_v32  ;;  %v5595_v32 = vld [vmem:[#allocation9 + $0x120] ss:$16 sps:$4 sm:$0xff]  }
 0x7dd   :  { %3742 = vmatpush1.bf16.msra.mxu1 %v5529_v28  ;;  %v5592_v28 = vld [vmem:[#allocation9 + $0x148] ss:$16 sps:$4 sm:$0xff]  }
 0x7de   :  { %3743 = vmatprep.subr.bf16.mxu1 %v5537_v31  ;;  %3787 = vmatpush1.bf16.msra.mxu0 %v5538_v34  ;;  %v5600_v31 = vld [vmem:[#allocation9 + $0x12c] ss:$16 sps:$4 sm:$0xff]   ;;  %v5603_v34 = vld [vmem:[#allocation9 + $0x104] ss:$16 sps:$4 sm:$0xff]  }
 0x7df   :  { %3788 = vmatprep.subr.bf16.mxu0 %v5546_v36  ;;  %v5601_v36 = vld [vmem:[#allocation9 + $0x100] ss:$16 sps:$4 sm:$0xff]  }
 0x7e1   :  { %3744 = vmatpush1.bf16.msra.mxu1 %v5535_v33  ;;  %v5598_v33 = vld [vmem:[#allocation9 + $0x128] ss:$16 sps:$4 sm:$0xff]  }
 0x7e2   :  { %3745 = vmatprep.subr.bf16.mxu1 %v5543_v35  ;;  %3789 = vmatpush1.bf16.msra.mxu0 %v5544_v41  ;;  %v5606_v35 = vld [vmem:[#allocation9 + $0x10c] ss:$16 sps:$4 sm:$0xff]  }
 0x7e3   :  { %3790 = vmatprep.subr.bf16.mxu0 %v5552_v43  ;;  %v5609_v41 = vld [vmem:[#allocation10 + $0x74] ss:$8 sps:$4 sm:$0xff]  }
 0x7e5   :  { %3746 = vmatpush1.bf16.msra.mxu1 %v5541_v40  ;;  %v5604_v40 = vld [vmem:[#allocation9 + $0x108] ss:$16 sps:$4 sm:$0xff]  }
 0x7e6   :  { %3747 = vmatprep.subr.bf16.mxu1 %v5549_v42  ;;  %3791 = vmatpush1.bf16.msra.mxu0 %v5550_v46  ;;  %v5612_v42 = vld [vmem:[#allocation10 + $0x174] ss:$8 sps:$4 sm:$0xff]  }
 0x7e7   :  { %3792 = vmatprep.subr.bf16.mxu0 %v5558_v48 }
 0x7e9   :  { %3748 = vmatpush1.bf16.msra.mxu1 %v5547_v45 }
 0x7ea   :  { %3749 = vmatprep.subr.bf16.mxu1 %v5555_v47  ;;  %3793 = vmatpush1.bf16.msra.mxu0 %v5556_v50  ;;  %v3262_v50 = vld [vmem:[%s6384_s8] sm:$0x3] }
 0x7eb   :  { %3794 = vmatprep.subr.bf16.mxu0 %v5564_v52  ;;  %v3263_v52 = vld [vmem:[%s6385_s9] sm:$0x3] }
 0x7ed   :  { %3750 = vmatpush1.bf16.msra.mxu1 %v5553_v49 }
 0x7ee   :  { %3751 = vmatprep.subr.bf16.mxu1 %v5561_v51  ;;  %3795 = vmatpush2.bf16.msra.mxu0 %v5562_v55  ;;  %v3301_v55 = vrot.slane %v3262_v50, %v6081_v0 }
 0x7ef   :  { %3796 = vmatprep.subr.bf16.mxu0 %v5570_v12 }
 0x7f1   :  { %3752 = vmatpush2.bf16.msra.mxu1 %v5559_v53 }
 0x7f2   :  { %3753 = vmatprep.subr.bf16.mxu1 %v5567_v11  ;;  %3797 = vmatpush2.bf16.msra.mxu0 %v5568_v57 }
 0x7f5   :  { %3754 = vmatpush2.bf16.msra.mxu1 %v5565_v18 }
 0x85c   :  { %v3266_v59 = vpop.xlane.xlu0 %3265 }
 0x85d   :  { %v3271_v60 = vmul.f32 0.00390625, %v3266_v59  ;;  %v3305_v59 = vrot.slane %v3262_v50, %v6078_v63  ;;  %v5658_v50 = vld [vmem:[#allocation10 + $0x1f0] ss:$8 sps:$4 sm:$0xff]  }
 0x85f   :  { %v6284_v1 = vsub.f32 %v6268_v37, %v3271_v60  ;;  %v6287_v2 = vsub.f32 %v6271_v8, %v3271_v60 }
 0x860   :  { %v3269_v3 = vpop.xlane.xlu1 %3268 }
 0x861   :  { %v3272_v4 = vmul.f32 0.00390625, %v3269_v3  ;;  %v3277_v5 = vmul.f32 %v6284_v1, %v6284_v1  ;;  %v3278_v6 = vmul.f32 %v6287_v2, %v6287_v2 }
 0x863   :  { %v6294_v54 = vsub.f32 %v6276_v13, %v3272_v4  ;;  %v6297_v7 = vsub.f32 %v6279_v15, %v3272_v4  ;;  %v3281_v9 = vadd.f32 %v3278_v6, %v3277_v5  ;;  %v5573_v13 = vld [vmem:[#allocation9 + $0x1a4] ss:$16 sps:$4 sm:$0xff]   ;;  %v5576_v15 = vld [vmem:[#allocation9 + $0x1ac] ss:$16 sps:$4 sm:$0xff]   ;;  %v3316_v4 = vrot.slane %v3263_v52, %v6081_v0 }
 0x864   :  { %3755 = vmatprep.subr.bf16.mxu1 %v5573_v13  ;;  %3798 = vmatprep.subr.bf16.mxu0 %v5576_v15  ;;  %v3320_v5 = vrot.slane %v3263_v52, %v6078_v63  ;;  %v5607_v13 = vld [vmem:[#allocation10 + $0x70] ss:$8 sps:$4 sm:$0xff]   ;;  %v5666_v52 = vld [vmem:[#allocation10 + $0x1e4] ss:$8 sps:$4 sm:$0xff]  }
 0x865   :  { %3282 = vadd.xlane.f32.xlu0 %v3281_v9  ;;  %v3279_v37 = vmul.f32 %v6294_v54, %v6294_v54  ;;  %v3280_v8 = vmul.f32 %v6297_v7, %v6297_v7  ;;  %3756 = vmatpush2.bf16.msra.mxu1 %v5571_v16  ;;  %v5610_v15 = vld [vmem:[#allocation10 + $0x170] ss:$8 sps:$4 sm:$0xff]   ;;  %v5618_v16 = vld [vmem:[#allocation10 + $0x164] ss:$8 sps:$4 sm:$0xff]  }
 0x866   :  { %3799 = vmatpush2.bf16.msra.mxu0 %v5574_v29  ;;  %3757 = vmatprep.subr.bf16.mxu1 %v5579_v20  ;;  %v5613_v29 = vld [vmem:[#allocation10 + $0x60] ss:$8 sps:$4 sm:$0xff]  }
 0x867   :  { %v3284_v10 = vadd.f32 %v3280_v8, %v3279_v37  ;;  %3800 = vmatprep.subr.bf16.mxu0 %v5582_v23  ;;  %v5616_v20 = vld [vmem:[#allocation10 + $0x160] ss:$8 sps:$4 sm:$0xff]   ;;  %v5619_v23 = vld [vmem:[#allocation10 + $0x50] ss:$8 sps:$4 sm:$0xff]  }
 0x869   :  { %3285 = vadd.xlane.f32.xlu0 %v3284_v10  ;;  %3758 = vmatpush2.bf16.msra.mxu1 %v5577_v21  ;;  %v5621_v21 = vld [vmem:[#allocation10 + $0x54] ss:$8 sps:$4 sm:$0xff]  }
 0x86a   :  { %3801 = vmatpush2.bf16.msra.mxu0 %v5580_v22  ;;  %3759 = vmatprep.subr.bf16.mxu1 %v5585_v14  ;;  %v5624_v22 = vld [vmem:[#allocation10 + $0x154] ss:$8 sps:$4 sm:$0xff]   ;;  %v5622_v14 = vld [vmem:[#allocation10 + $0x150] ss:$8 sps:$4 sm:$0xff]  }
 0x86b   :  { %3802 = vmatprep.subr.bf16.mxu0 %v5588_v17  ;;  %v5627_v17 = vld [vmem:[#allocation10 + $0x44] ss:$8 sps:$4 sm:$0xff]  }
 0x86d   :  { %3760 = vmatpush2.bf16.msra.mxu1 %v5583_v24  ;;  %v5630_v24 = vld [vmem:[#allocation10 + $0x144] ss:$8 sps:$4 sm:$0xff]  }
 0x86e   :  { %3803 = vmatpush2.bf16.msra.mxu0 %v5586_v19  ;;  %3761 = vmatprep.subr.bf16.mxu1 %v5591_v25  ;;  %v5625_v19 = vld [vmem:[#allocation10 + $0x40] ss:$8 sps:$4 sm:$0xff]  }
 0x86f   :  { %3804 = vmatprep.subr.bf16.mxu0 %v5594_v26  ;;  %v5628_v25 = vld [vmem:[#allocation10 + $0x140] ss:$8 sps:$4 sm:$0xff]   ;;  %v5633_v26 = vld [vmem:[#allocation10 + $0x34] ss:$8 sps:$4 sm:$0xff]  }
 0x871   :  { %3762 = vmatpush2.bf16.msra.mxu1 %v5589_v27  ;;  %v5636_v27 = vld [vmem:[#allocation10 + $0x134] ss:$8 sps:$4 sm:$0xff]  }
 0x872   :  { %3805 = vmatpush2.bf16.msra.mxu0 %v5592_v28  ;;  %3763 = vmatprep.subr.bf16.mxu1 %v5597_v30  ;;  %v5631_v28 = vld [vmem:[#allocation10 + $0x30] ss:$8 sps:$4 sm:$0xff]  }
 0x873   :  { %3806 = vmatprep.subr.bf16.mxu0 %v5600_v31  ;;  %v5634_v30 = vld [vmem:[#allocation10 + $0x130] ss:$8 sps:$4 sm:$0xff]   ;;  %v5639_v31 = vld [vmem:[#allocation10 + $0x24] ss:$8 sps:$4 sm:$0xff]  }
 0x875   :  { %3764 = vmatpush2.bf16.msra.mxu1 %v5595_v32  ;;  %v5642_v32 = vld [vmem:[#allocation10 + $0x124] ss:$8 sps:$4 sm:$0xff]  }
 0x876   :  { %3807 = vmatpush2.bf16.msra.mxu0 %v5598_v33  ;;  %3765 = vmatprep.subr.bf16.mxu1 %v5603_v34  ;;  %v5637_v33 = vld [vmem:[#allocation10 + $0x20] ss:$8 sps:$4 sm:$0xff]  }
 0x877   :  { %3808 = vmatprep.subr.bf16.mxu0 %v5606_v35  ;;  %v5640_v34 = vld [vmem:[#allocation10 + $0x120] ss:$8 sps:$4 sm:$0xff]   ;;  %v5645_v35 = vld [vmem:[#allocation10 + $0x14] ss:$8 sps:$4 sm:$0xff]  }
 0x879   :  { %3766 = vmatpush2.bf16.msra.mxu1 %v5601_v36  ;;  %v5648_v36 = vld [vmem:[#allocation10 + $0x114] ss:$8 sps:$4 sm:$0xff]  }
 0x87a   :  { %3809 = vmatpush2.bf16.msra.mxu0 %v5604_v40  ;;  %4229 = vmatprep.subr.bf16.mxu1 %v5609_v41  ;;  %v5643_v40 = vld [vmem:[#allocation10 + $0x10] ss:$8 sps:$4 sm:$0xff]  }
 0x87b   :  { %4272 = vmatprep.subr.bf16.mxu0 %v5612_v42  ;;  %v5646_v41 = vld [vmem:[#allocation10 + $0x110] ss:$8 sps:$4 sm:$0xff]   ;;  %v5651_v42 = vld [vmem:[#allocation10 + $0x4] ss:$8 sps:$4 sm:$0xff]  }
 0x8ee   :  { %v3283_v43 = vpop.xlane.xlu0 %3282 }
 0x8ef   :  { %v3287_v45 = vmul.f32 0.00390625, %v3283_v43  ;;  %v5654_v43 = vld [vmem:[#allocation10 + $0x104] ss:$8 sps:$4 sm:$0xff]  }
 0x8f1   :  { %v3289_v46 = vadd.f32 1e-05, %v3287_v45  ;;  %v5649_v45 = vld [vmem:[#allocation10] ss:$8 sps:$4 sm:$0xff]  }
 0x8f2   :  { %v3286_v47 = vpop.xlane.xlu0 %3285 }
 0x8f3   :  { %5751 = vrsqrt.f32 %v3289_v46  ;;  %v3288_v48 = vmul.f32 0.00390625, %v3286_v47  ;;  %v5652_v46 = vld [vmem:[#allocation10 + $0x100] ss:$8 sps:$4 sm:$0xff]   ;;  %v5657_v47 = vld [vmem:[#allocation10 + $0xf4] ss:$8 sps:$4 sm:$0xff]  }
 0x8f5   :  { %v3290_v49 = vadd.f32 1e-05, %v3288_v48  ;;  %v5660_v48 = vld [vmem:[#allocation10 + $0x1f4] ss:$8 sps:$4 sm:$0xff]  }
 0x8f7   :  { %5753 = vrsqrt.f32 %v3290_v49  ;;  %v5655_v49 = vld [vmem:[#allocation10 + $0xf0] ss:$8 sps:$4 sm:$0xff]  }
 0x900   :  { %v5752_v51 = vpop.eup %5751 }
 0x901   :  { %v3294_v53 = vmul.f32 %v5752_v51, %v6287_v2  ;;  %v3293_v60 = vmul.f32 %v5752_v51, %v6284_v1  ;;  %v5663_v51 = vld [vmem:[#allocation10 + $0xe4] ss:$8 sps:$4 sm:$0xff]  }
 0x903   :  { %v3309_v9 = vmul.f32 %v3305_v59, %v3294_v53  ;;  %v3308_v8 = vmul.f32 %v3301_v55, %v3293_v60  ;;  %v5661_v53 = vld [vmem:[#allocation10 + $0xe0] ss:$8 sps:$4 sm:$0xff]   ;;  %v5672_v60 = vld [vmem:[#allocation10 + $0x1d4] ss:$8 sps:$4 sm:$0xff]  }
 0x904   :  { %v5754_v3 = vpop.eup %5753 }
 0x905   :  { %v3296_v6 = vmul.f32 %v5754_v3, %v6297_v7  ;;  %v3295_v37 = vmul.f32 %v5754_v3, %v6294_v54  ;;  %v6317_v2 = vadd.f32 %v3320_v5, %v3309_v9  ;;  %v6321_v18 = vadd.f32 %v3316_v4, %v3308_v8  ;;  %v5615_v54 = vld [vmem:[#allocation10 + $0x64] ss:$8 sps:$4 sm:$0xff]   ;;  %v5667_v3 = vld [vmem:[#allocation10 + $0xd0] ss:$8 sps:$4 sm:$0xff]   ;;  %v5673_v9 = vld [vmem:[#allocation10 + $0xc0] ss:$8 sps:$4 sm:$0xff]  }
 0x906   :  { %v5681_v8 = vld [vmem:[#allocation10 + $0xb4] ss:$8 sps:$4 sm:$0xff]  }
 0x907   :  { %v3311_v10 = vmul.f32 %v3305_v59, %v3296_v6  ;;  %v3310_v11 = vmul.f32 %v3301_v55, %v3295_v37  ;;  %v5664_v55 = vld [vmem:[#allocation10 + $0x1e0] ss:$8 sps:$4 sm:$0xff]   ;;  %v5669_v59 = vld [vmem:[#allocation10 + $0xd4] ss:$8 sps:$4 sm:$0xff]   ;;  %v5678_v6 = vld [vmem:[#allocation10 + $0x1c4] ss:$8 sps:$4 sm:$0xff]  }
 0x908   :  { %v5676_v37 = vld [vmem:[#allocation10 + $0x1c0] ss:$8 sps:$4 sm:$0xff]  }
 0x909   :  { %v6319_v12 = vadd.f32 %v3320_v5, %v3311_v10  ;;  %v6323_v1 = vadd.f32 %v3316_v4, %v3310_v11  ;;  %v5670_v4 = vld [vmem:[#allocation10 + $0x1d0] ss:$8 sps:$4 sm:$0xff]   ;;  %v5675_v5 = vld [vmem:[#allocation10 + $0xc4] ss:$8 sps:$4 sm:$0xff]   ;;  %v5684_v10 = vld [vmem:[#allocation10 + $0x1b4] ss:$8 sps:$4 sm:$0xff]  }
 0x90a   :  { %v5679_v11 = vld [vmem:[#allocation10 + $0xb0] ss:$8 sps:$4 sm:$0xff]  }
 0x90b   :  { %v3328_v57 = vpack.c.bf16 %v6319_v12, %v6317_v2  ;;  %v3327_v7 = vpack.c.bf16 %v6323_v1, %v6321_v18 }
 0x90d   :  { %3767 = vmatprep.mubr.bf16.mxu1 %v3328_v57  ;;  %3810 = vmatprep.mubr.bf16.mxu0 %v3328_v57  ;;  %v5682_v57 = vld [vmem:[#allocation10 + $0x1b0] ss:$8 sps:$4 sm:$0xff]  }
 0x90e   :  { %3768 = vmatmul.mubr.bf16.vlgmr.msra.gmra.mxu1 %v3327_v7  ;;  %3811 = vmatmul.mubr.bf16.vlgmr.msra.gmra.mxu0 %v3327_v7  ;;  %v5687_v7 = vld [vmem:[#allocation10 + $0xa4] ss:$8 sps:$4 sm:$0xff]  }
 0x90f   :  { %4230 = vmatpush1.bf16.msra.mxu1 %v5607_v13  ;;  %4273 = vmatpush1.bf16.msra.mxu0 %v5610_v15  ;;  %v5690_v13 = vld [vmem:[#allocation10 + $0x1a4] ss:$8 sps:$4 sm:$0xff]   ;;  %v5685_v15 = vld [vmem:[#allocation10 + $0xa0] ss:$8 sps:$4 sm:$0xff]  }
 0x910   :  { %4231 = vmatprep.subr.bf16.mxu1 %v5615_v54  ;;  %4274 = vmatprep.subr.bf16.mxu0 %v5618_v16  ;;  %v5688_v54 = vld [vmem:[#allocation10 + $0x1a0] ss:$8 sps:$4 sm:$0xff]   ;;  %v5693_v16 = vld [vmem:[#allocation10 + $0x94] ss:$8 sps:$4 sm:$0xff]  }
 0x913   :  { %4232 = vmatpush1.bf16.msra.mxu1 %v5613_v29  ;;  %4275 = vmatpush1.bf16.msra.mxu0 %v5616_v20  ;;  %v5696_v29 = vld [vmem:[#allocation10 + $0x194] ss:$8 sps:$4 sm:$0xff]   ;;  %v5691_v20 = vld [vmem:[#allocation10 + $0x90] ss:$8 sps:$4 sm:$0xff]  }
 0x914   :  { %4233 = vmatprep.subr.bf16.mxu1 %v5621_v21  ;;  %4276 = vmatprep.subr.bf16.mxu0 %v5624_v22  ;;  %v5694_v21 = vld [vmem:[#allocation10 + $0x190] ss:$8 sps:$4 sm:$0xff]   ;;  %v5699_v22 = vld [vmem:[#allocation10 + $0x84] ss:$8 sps:$4 sm:$0xff]  }
 0x917   :  { %4234 = vmatpush1.bf16.msra.mxu1 %v5619_v23  ;;  %4277 = vmatpush1.bf16.msra.mxu0 %v5622_v14  ;;  %v5702_v23 = vld [vmem:[#allocation10 + $0x184] ss:$8 sps:$4 sm:$0xff]   ;;  %v5697_v14 = vld [vmem:[#allocation10 + $0x80] ss:$8 sps:$4 sm:$0xff]  }
 0x918   :  { %4235 = vmatprep.subr.bf16.mxu1 %v5627_v17  ;;  %4278 = vmatprep.subr.bf16.mxu0 %v5630_v24  ;;  %v5700_v17 = vld [vmem:[#allocation10 + $0x180] ss:$8 sps:$4 sm:$0xff]  }
 0x919   :  { %v3393_v24 = vld [vmem:[%s6389_s13] sm:$0xf] }
 0x91b   :  { %4236 = vmatpush1.bf16.msra.mxu1 %v5625_v19  ;;  %4279 = vmatpush1.bf16.msra.mxu0 %v5628_v25 }
 0x91c   :  { %4237 = vmatprep.subr.bf16.mxu1 %v5633_v26  ;;  %4280 = vmatprep.subr.bf16.mxu0 %v5636_v27  ;;  %v3402_v26 = vrot.slane %v3393_v24, %v6078_v63  ;;  %v3410_v27 = vrot.slane %v3393_v24, %v1050_v58 }
 0x91f   :  { %4238 = vmatpush1.bf16.msra.mxu1 %v5631_v28  ;;  %4281 = vmatpush1.bf16.msra.mxu0 %v5634_v30  ;;  %v3398_v28 = vrot.slane %v3393_v24, %v6081_v0  ;;  %v3406_v30 = vrot.slane %v3393_v24, %v1046_v56 }
 0x920   :  { %4239 = vmatprep.subr.bf16.mxu1 %v5639_v31  ;;  %4282 = vmatprep.subr.bf16.mxu0 %v5642_v32 }
 0x923   :  { %4240 = vmatpush1.bf16.msra.mxu1 %v5637_v33  ;;  %4283 = vmatpush1.bf16.msra.mxu0 %v5640_v34 }
 0x924   :  { %4241 = vmatprep.subr.bf16.mxu1 %v5645_v35  ;;  %4284 = vmatprep.subr.bf16.mxu0 %v5648_v36 }
 0x927   :  { %4242 = vmatpush1.bf16.msra.mxu1 %v5643_v40  ;;  %4285 = vmatpush1.bf16.msra.mxu0 %v5646_v41 }
 0x928   :  { %4243 = vmatprep.subr.bf16.mxu1 %v5651_v42  ;;  %4286 = vmatprep.subr.bf16.mxu0 %v5654_v43 }
 0x92b   :  { %4244 = vmatpush1.bf16.msra.mxu1 %v5649_v45  ;;  %4287 = vmatpush1.bf16.msra.mxu0 %v5652_v46 }
 0x92c   :  { %4245 = vmatprep.subr.bf16.mxu1 %v5657_v47  ;;  %4288 = vmatprep.subr.bf16.mxu0 %v5660_v48 }
 0x92f   :  { %4246 = vmatpush2.bf16.msra.mxu1 %v5655_v49  ;;  %4289 = vmatpush2.bf16.msra.mxu0 %v5658_v50 }
 0x930   :  { %4247 = vmatprep.subr.bf16.mxu1 %v5663_v51  ;;  %4290 = vmatprep.subr.bf16.mxu0 %v5666_v52 }
 0x933   :  { %4248 = vmatpush2.bf16.msra.mxu1 %v5661_v53  ;;  %4291 = vmatpush2.bf16.msra.mxu0 %v5664_v55 }
 0x934   :  { %4249 = vmatprep.subr.bf16.mxu1 %v5669_v59  ;;  %4292 = vmatprep.subr.bf16.mxu0 %v5672_v60 }
 0x937   :  { %4250 = vmatpush2.bf16.msra.mxu1 %v5667_v3  ;;  %4293 = vmatpush2.bf16.msra.mxu0 %v5670_v4  ;;  %v3897_v4 = vld [vmem:[%s6391_s15] sm:$0x3] }
 0x938   :  { %4251 = vmatprep.subr.bf16.mxu1 %v5675_v5  ;;  %4294 = vmatprep.subr.bf16.mxu0 %v5678_v6  ;;  %v3902_v5 = vrot.slane %v3897_v4, %v6081_v0  ;;  %v3906_v6 = vrot.slane %v3897_v4, %v6078_v63 }
 0x93b   :  { %4252 = vmatpush2.bf16.msra.mxu1 %v5673_v9  ;;  %4295 = vmatpush2.bf16.msra.mxu0 %v5676_v37 }
 0x93c   :  { %4253 = vmatprep.subr.bf16.mxu1 %v5681_v8  ;;  %4296 = vmatprep.subr.bf16.mxu0 %v5684_v10 }
 0x93f   :  { %4254 = vmatpush2.bf16.msra.mxu1 %v5679_v11  ;;  %4297 = vmatpush2.bf16.msra.mxu0 %v5682_v57 }
 0x940   :  { %4255 = vmatprep.subr.bf16.mxu1 %v5687_v7  ;;  %4298 = vmatprep.subr.bf16.mxu0 %v5690_v13 }
 0x943   :  { %4256 = vmatpush2.bf16.msra.mxu1 %v5685_v15  ;;  %4299 = vmatpush2.bf16.msra.mxu0 %v5688_v54 }
 0x944   :  { %4257 = vmatprep.subr.bf16.mxu1 %v5693_v16  ;;  %4300 = vmatprep.subr.bf16.mxu0 %v5696_v29 }
 0x947   :  { %4258 = vmatpush2.bf16.msra.mxu1 %v5691_v20  ;;  %4301 = vmatpush2.bf16.msra.mxu0 %v5694_v21 }
 0x948   :  { %4259 = vmatprep.subr.bf16.mxu1 %v5699_v22  ;;  %4302 = vmatprep.subr.bf16.mxu0 %v5702_v23 }
 0x94b   :  { %4260 = vmatpush2.bf16.msra.mxu1 %v5697_v14  ;;  %4303 = vmatpush2.bf16.msra.mxu0 %v5700_v17 }
 0x9ce   :  { %v3769_v19 = vpop.f32.mrf.mxu1  ;;  %v3812_v25 = vpop.f32.mrf.mxu0 }
 0x9cf   :  { %v3770_v42 = vadd.f32 %v3769_v19, %v3398_v28  ;;  %v3813_v43 = vadd.f32 %v3812_v25, %v3406_v30 }
 0x9d0   :  { %v3771_v31 = vpop.f32.mrf.mxu1  ;;  %v3814_v32 = vpop.f32.mrf.mxu0 }
 0x9d1   :  { %v3772_v35 = vadd.f32 %v3771_v31, %v3402_v26  ;;  %v3815_v36 = vadd.f32 %v3814_v32, %v3410_v27  ;;  %v3821_v52 = vmax.f32 %v3770_v42, 0.0  ;;  %v3823_v53 = vmax.f32 %v3813_v43, 0.0  ;;  %v5704_v42 = vld [vmem:[#allocation12 + $0x38] sm:$0xff]   ;;  %v5705_v43 = vld [vmem:[#allocation12 + $0x70] sm:$0xff]  }
 0x9d2   :  { %v3773_v33 = vpop.f32.mrf.mxu1  ;;  %v3816_v34 = vpop.f32.mrf.mxu0 }
 0x9d3   :  { %v3774_v40 = vadd.f32 %v3773_v33, %v3398_v28  ;;  %v3817_v41 = vadd.f32 %v3816_v34, %v3406_v30  ;;  %v3822_v50 = vmax.f32 %v3772_v35, 0.0  ;;  %v3824_v51 = vmax.f32 %v3815_v36, 0.0 }
 0x9d4   :  { %v3775_v45 = vpop.f32.mrf.mxu1  ;;  %v3818_v46 = vpop.f32.mrf.mxu0 }
 0x9d5   :  { %v3776_v47 = vadd.f32 %v3775_v45, %v3402_v26  ;;  %v3819_v48 = vadd.f32 %v3818_v46, %v3410_v27  ;;  %v3825_v58 = vmax.f32 %v3774_v40, 0.0  ;;  %v3827_v49 = vmax.f32 %v3817_v41, 0.0  ;;  %v5703_v27 = vld [vmem:[#allocation12 + $0x78] sm:$0xff]   ;;  %v5706_v45 = vld [vmem:[#allocation12 + $0x30] sm:$0xff]   ;;  %v5707_v46 = vld [vmem:[#allocation12 + $0x68] sm:$0xff]  }
 0x9d6   :  { %5043 = vmatprep.subr.bf16.mxu1 %v5703_v27 }
 0x9d7   :  { %v3826_v62 = vmax.f32 %v3776_v47, 0.0  ;;  %v3828_v56 = vmax.f32 %v3819_v48, 0.0  ;;  %v3829_v60 = vpack.c.bf16 %v3825_v58, %v3821_v52  ;;  %v3831_v3 = vpack.c.bf16 %v3827_v49, %v3823_v53  ;;  %v5708_v47 = vld [vmem:[#allocation12 + $0x28] sm:$0xff]   ;;  %v5709_v48 = vld [vmem:[#allocation12 + $0x60] sm:$0xff]   ;;  %v5711_v49 = vld [vmem:[#allocation12 + $0x58] sm:$0xff]  }
 0x9d8   :  { %v5710_v58 = vld [vmem:[#allocation12 + $0x20] sm:$0xff]   ;;  %v5716_v52 = vld [vmem:[#allocation12 + $0x8] sm:$0xff]  }
 0x9d9   :  { %v3830_v55 = vpack.c.bf16 %v3826_v62, %v3822_v50  ;;  %v3832_v59 = vpack.c.bf16 %v3828_v56, %v3824_v51  ;;  %v5712_v50 = vld [vmem:[#allocation12 + $0x18] sm:$0xff]   ;;  %v5713_v51 = vld [vmem:[#allocation12 + $0x50] sm:$0xff]   ;;  %v5715_v56 = vld [vmem:[#allocation12 + $0x48] sm:$0xff]  }
 0x9da   :  { %v5714_v62 = vld [vmem:[#allocation12 + $0x10] sm:$0xff]   ;;  %v5717_v53 = vld [vmem:[#allocation12 + $0x40] sm:$0xff]  }
 0x9db   :  { %4261 = vmatprep.mubr.bf16.mxu1 %v3830_v55  ;;  %4304 = vmatprep.mubr.bf16.mxu0 %v3832_v59  ;;  %v5718_v55 = vld [vmem:[#allocation12] sm:$0xff]  }
 0x9dc   :  { %4262 = vmatmul.mubr.bf16.vlgmr.msra.gmra.mxu1 %v3829_v60  ;;  %4305 = vmatmul.mubr.bf16.vlgmr.msra.gmra.mxu0 %v3831_v3 }
 0x9dd   :  { %5044 = vmatpush3.bf16.msra.mxu1 %v5704_v42 }
 0x9de   :  { %5045 = vmatprep.subr.bf16.mxu1 %v5705_v43 }
 0x9e1   :  { %5046 = vmatpush3.bf16.msra.mxu1 %v5706_v45 }
 0x9e2   :  { %5047 = vmatprep.subr.bf16.mxu1 %v5707_v46 }
 0x9e5   :  { %5048 = vmatpush3.bf16.msra.mxu1 %v5708_v47 }
 0x9e6   :  { %5049 = vmatprep.subr.bf16.mxu1 %v5709_v48 }
 0x9e9   :  { %5050 = vmatpush3.bf16.msra.mxu1 %v5710_v58 }
 0x9ea   :  { %5051 = vmatprep.subr.bf16.mxu1 %v5711_v49 }
 0x9ed   :  { %5052 = vmatpush3.bf16.msra.mxu1 %v5712_v50 }
 0x9ee   :  { %5053 = vmatprep.subr.bf16.mxu1 %v5713_v51 }
 0x9f1   :  { %5054 = vmatpush3.bf16.msra.mxu1 %v5714_v62 }
 0x9f2   :  { %5055 = vmatprep.subr.bf16.mxu1 %v5715_v56 }
 0x9f5   :  { %5056 = vmatpush3.bf16.msra.mxu1 %v5716_v52 }
 0x9f6   :  { %5057 = vmatprep.subr.bf16.mxu1 %v5717_v53 }
 0x9f9   :  { %5058 = vmatpush3.bf16.msra.mxu1 %v5718_v55 }
 0xa9c   :  { %v4263_v9 = vpop.f32.mrf.mxu1  ;;  %v4306_v37 = vpop.f32.mrf.mxu0 }
 0xa9d   :  { %v4264_v8 = vadd.f32 %v4263_v9, %v3902_v5  ;;  %v4319_v9 = vld [vmem:[%s6386_s10] sm:$0x3] }
 0xa9e   :  { %v4265_v10 = vpop.f32.mrf.mxu1  ;;  %v4308_v11 = vpop.f32.mrf.mxu0 }
 0xa9f   :  { %v4307_v57 = vadd.f32 %v4306_v37, %v4264_v8  ;;  %v4266_v7 = vadd.f32 %v4265_v10, %v3906_v6  ;;  %v4320_v8 = vld [vmem:[%s6387_s11] sm:$0x3] }
 0xaa0   :  { %v4267_v13 = vpop.f32.mrf.mxu1  ;;  %v4310_v15 = vpop.f32.mrf.mxu0 }
 0xaa1   :  { %v4309_v54 = vadd.f32 %v4308_v11, %v4266_v7  ;;  %v4268_v16 = vadd.f32 %v4267_v13, %v3902_v5  ;;  %v4315_v20 = vadd.f32 %v4307_v57, %v6321_v18  ;;  %v4357_v11 = vrot.slane %v4319_v9, %v6081_v0 }
 0xaa2   :  { %v4269_v29 = vpop.f32.mrf.mxu1  ;;  %v4312_v14 = vpop.f32.mrf.mxu0  ;;  %v4361_v57 = vrot.slane %v4319_v9, %v6078_v63 }
 0xaa3   :  { %v4316_v21 = vadd.f32 %v4309_v54, %v6317_v2  ;;  %v4311_v22 = vadd.f32 %v4310_v15, %v4268_v16  ;;  %v4270_v23 = vadd.f32 %v4269_v29, %v3906_v6  ;;  %v4372_v15 = vrot.slane %v4320_v8, %v6081_v0  ;;  %v4994_v0 = vld [vmem:[%s6393_s17] ss:$0 sm:$0xff] }
 0xaa4   :  { %v4376_v54 = vrot.slane %v4320_v8, %v6078_v63  ;;  %v4612_v63 = vsel %vm165_vm0, 1.0, %v5924_v61 }
 0xaa5   :  { %v4313_v17 = vadd.f32 %v4312_v14, %v4270_v23  ;;  %v4321_v24 = vadd.f32 %v4316_v21, %v4315_v20  ;;  %v4317_v19 = vadd.f32 %v4311_v22, %v6323_v1 }
 0xaa7   :  { %v4318_v25 = vadd.f32 %v4313_v17, %v6319_v12  ;;  %4322 = vadd.xlane.f32.xlu1 %v4321_v24 }
 0xaa9   :  { %v4324_v26 = vadd.f32 %v4318_v25, %v4317_v19 }
 0xaab   :  { %4325 = vadd.xlane.f32.xlu0 %v4324_v26 }
 0xb30   :  { %v4323_v28 = vpop.xlane.xlu1 %4322 }
 0xb31   :  { %v4327_v30 = vmul.f32 0.00390625, %v4323_v28 }
 0xb33   :  { %v4329_v31 = vsub.f32 %v4315_v20, %v4327_v30  ;;  %v4330_v18 = vsub.f32 %v4316_v21, %v4327_v30 }
 0xb34   :  { %v4326_v32 = vpop.xlane.xlu0 %4325 }
 0xb35   :  { %v4328_v2 = vmul.f32 0.00390625, %v4326_v32  ;;  %v4333_v33 = vmul.f32 %v4329_v31, %v4329_v31  ;;  %v4334_v34 = vmul.f32 %v4330_v18, %v4330_v18 }
 0xb37   :  { %v4331_v35 = vsub.f32 %v4317_v19, %v4328_v2  ;;  %v4332_v36 = vsub.f32 %v4318_v25, %v4328_v2  ;;  %v4337_v40 = vadd.f32 %v4334_v34, %v4333_v33  ;;  %v4613_v2 = vsel %vm166_vm1, 1.0, %v5924_v61 }
 0xb39   :  { %4338 = vadd.xlane.f32.xlu1 %v4337_v40  ;;  %v4335_v1 = vmul.f32 %v4331_v35, %v4331_v35  ;;  %v4336_v41 = vmul.f32 %v4332_v36, %v4332_v36 }
 0xb3b   :  { %v4340_v12 = vadd.f32 %v4336_v41, %v4335_v1 }
 0xb3d   :  { %4341 = vadd.xlane.f32.xlu0 %v4340_v12 }
 0xbc2   :  { %v4339_v59 = vpop.xlane.xlu1 %4338 }
 0xbc3   :  { %v4343_v60 = vmul.f32 0.00390625, %v4339_v59 }
 0xbc5   :  { %v4345_v3 = vadd.f32 1e-05, %v4343_v60 }
 0xbc6   :  { %v4342_v4 = vpop.xlane.xlu0 %4341 }
 0xbc7   :  { %5755 = vrsqrt.f32 %v4345_v3  ;;  %v4344_v5 = vmul.f32 0.00390625, %v4342_v4 }
 0xbc9   :  { %v4346_v6 = vadd.f32 1e-05, %v4344_v5 }
 0xbcb   :  { %5757 = vrsqrt.f32 %v4346_v6 }
 0xbd4   :  { %v5756_v37 = vpop.eup %5755 }
 0xbd5   :  { %v4350_v10 = vmul.f32 %v5756_v37, %v4330_v18  ;;  %v4349_v7 = vmul.f32 %v5756_v37, %v4329_v31  ;;  %v4561_v18 = vmul.f32 2.0, %v4612_v63 }
 0xbd7   :  { %v4365_v29 = vmul.f32 %v4361_v57, %v4350_v10  ;;  %v4364_v21 = vmul.f32 %v4357_v11, %v4349_v7 }
 0xbd8   :  { %v5758_v13 = vpop.eup %5757 }
 0xbd9   :  { %v4352_v16 = vmul.f32 %v5758_v13, %v4332_v36  ;;  %v4351_v20 = vmul.f32 %v5758_v13, %v4331_v35  ;;  %v4380_v14 = vadd.f32 %v4376_v54, %v4365_v29  ;;  %v4379_v24 = vadd.f32 %v4372_v15, %v4364_v21 }
 0xbda   :  { %v4562_v36 = vmul.f32 2.0, %v4613_v2 }
 0xbdb   :  { %v4367_v22 = vmul.f32 %v4361_v57, %v4352_v16  ;;  %v4366_v23 = vmul.f32 %v4357_v11, %v4351_v20 }
 0xbdd   :  { %v4382_v17 = vadd.f32 %v4376_v54, %v4367_v22  ;;  %v4381_v19 = vadd.f32 %v4372_v15, %v4366_v23 }
 0xbdf   :  { %v4384_v25 = vpack.c.bf16 %v4382_v17, %v4380_v14  ;;  %v4383_v26 = vpack.c.bf16 %v4381_v19, %v4379_v24 }
 0xbe1   :  { %4552 = vmatprep.mubr.bf16.mxu1 %v4384_v25 }
 0xbe2   :  { %4553 = vmatmul.mubr.bf16.vlgmr.msra.gmra.mxu1 %v4383_v26 }
 0xca2   :  { %v5059_v27 = vpop.f32.mrf.mxu1 }
 0xca4   :  { %v5060_v28 = vpop.f32.mrf.mxu1 }
 0xca5   :  { %v5061_v30 = vadd.f32 %v5060_v28, %v5059_v27 }
 0xca6   :  { %v5062_v31 = vpop.f32.mrf.mxu1 }
 0xca7   :  { %v4555_v32 = vadd.f32 %v5061_v30, %v4994_v0 }
 0xca8   :  { %v5063_v33 = vpop.f32.mrf.mxu1 }
 0xca9   :  { %v5064_v34 = vadd.f32 %v5063_v33, %v5062_v31  ;;  %v4563_v35 = vadd.f32 %v4561_v18, %v4555_v32 }
 0xcab   :  { %v4558_v38 = vadd.f32 %v5064_v34, %v4994_v0  ;;  %4565 = vmax.xlane.f32.xlu1 %v4563_v35 }
 0xcad   :  { %v4564_v40 = vadd.f32 %v4562_v36, %v4558_v38 }
 0xcaf   :  { %4567 = vmax.xlane.f32.xlu0 %v4564_v40 }
 0xd34   :  { %v4566_v1 = vpop.xlane.xlu1 %4565 }
 0xd35   :  { %vm4569_vm6 = vcmp.eq.f32.partialorder %v4563_v35, %v4566_v1 }
 0xd36   :  { %v4571_v41 = vsel %vm4569_vm6, %v6059_v39, 128 }
 0xd37   :  { %v4574_v12 = vshra.s32 %v4571_v41, 16  ;;  %v4573_v46 = vand.u32 65535, %v4571_v41 }
 0xd38   :  { %v4568_v42 = vpop.xlane.xlu0 %4567 }
 0xd39   :  { %vm4570_vm7 = vcmp.eq.f32.partialorder %v4564_v40, %v4568_v42  ;;  %v4576_v43 = vcvt.s32.f32 %v4574_v12  ;;  %v4575_v58 = vcvt.s32.f32 %v4573_v46 }
 0xd3a   :  { %v4572_v45 = vsel %vm4570_vm7, %v6059_v39, 128 }
 0xd3b   :  { %4577 = vmin.xlane.f32.xlu1 %v4576_v43  ;;  %v4588_v44 = vshra.s32 %v4572_v45, 16  ;;  %v4587_v47 = vand.u32 65535, %v4572_v45 }
 0xd3d   :  { %v4590_v61 = vcvt.s32.f32 %v4588_v44  ;;  %v4589_v51 = vcvt.s32.f32 %v4587_v47 }
 0xd3f   :  { %4591 = vmin.xlane.f32.xlu0 %v4590_v61 }
 0xdc4   :  { %v4578_v48 = vpop.xlane.xlu1 %4577 }
 0xdc5   :  { %vm4579_vm8 = vcmp.eq.f32.partialorder %v4576_v43, %v4578_v48  ;;  %v4584_v56 = vcvt.f32.s32 %v4578_v48 }
 0xdc6   :  { %v4580_v49 = vsel %vm4579_vm8, %v4575_v58, inf }
 0xdc7   :  { %4581 = vmin.xlane.f32.xlu1 %v4580_v49  ;;  %v4585_v53 = vshll.u32 %v4584_v56, 16 }
 0xdc8   :  { %v4592_v50 = vpop.xlane.xlu0 %4591 }
 0xdc9   :  { %vm4593_vm9 = vcmp.eq.f32.partialorder %v4590_v61, %v4592_v50  ;;  %v4598_v39 = vcvt.f32.s32 %v4592_v50 }
 0xdca   :  { %v4594_v62 = vsel %vm4593_vm9, %v4589_v51, inf }
 0xdcb   :  { %4595 = vmin.xlane.f32.xlu0 %v4594_v62  ;;  %v4599_v3 = vshll.u32 %v4598_v39, 16 }
 0xe50   :  { %v4582_v52 = vpop.xlane.xlu1 %4581 }
 0xe51   :  { %v4583_v55 = vcvt.f32.s32 %v4582_v52 }
 0xe53   :  { %v4586_v59 = vadd.s32 %v4585_v53, %v4583_v55 }
 0xe54   :  { %v4596_v60 = vpop.xlane.xlu0 %4595 }
 0xe55   :  { %4602 = vst.msk [vmem:[%s6394_s18] sm:$0xff] %vm4601_vm10, %v4586_v59  ;;  %v4597_v4 = vcvt.f32.s32 %v4596_v60 }
 0xe57   :  { %v4600_v5 = vadd.s32 %v4599_v3, %v4597_v4 }
 0xe59   :  { %4603 = vst.msk [vmem:[%s6394_s18 + $0x8] sm:$0xff] %vm4601_vm10, %v4600_v5 }
 0xe5a   :  { %4608 = vsyncpa [#allocation3], 1 }
 0xe5b   :  { %4609 = vsyncpa [#allocation5], 1 }
 0xe5c   :  { %4610 = vsyncpa [#allocation8], 1 }
 0xe5d   :  { %4611 = vsyncpa [#allocation11], 1 }

</bundles_post_ra>
